<compile_context>
chip_gen: v5e
topology: v5e:2x2
jax: 0.10.0
libtpu: 0.0.40
codegen_flags: <defaults>
</compile_context>

<pallas_src>
import jax
import jax.numpy as jnp
from jax.experimental import pallas as pl
from jax.experimental.pallas import tpu as pltpu

# ----------------------------- model hyper-parameters -----------------------------
N_LAYERS = 2          # encoder.layers
D_MODEL  = 32         # encoder.layers[0].size
N_HEADS  = 4
D_HEAD   = D_MODEL // N_HEADS
D_FF     = 64
PROJ_DIM = 128        # ProjectionHead projection_dim (module default)
SEQ      = 8
BATCH    = 2
TOKENS   = BATCH * SEQ
EPS_LN   = 1e-6       # LayerNorm eps (Annotated Transformer)
EPS_NORM = 1e-12      # F.normalize eps
NEG_INF  = -1e30
FF_PAD   = 128        # FFN hidden width zero-padded to a full lane

# ------------------------- single packed-parameter slab ---------------------------
# One lane-dense (SLAB_ROWS, 128) f32 slab.  Per-layer block (stride 256 rows):
#   [  0: 32) W_qkv fused   lanes 0:32 Wq | 32:64 Wk | 64:96 Wv | 96:128 zero
#   [ 32]     b_qkv fused
#   [ 33: 37) ln_a(attn), ln_b(attn), ln_a(ff), ln_b(ff)   (lanes 0:32)
#   [ 40: 72) W_o   zero-padded to 128 output lanes
#   [ 72]     b_o   (padded)
#   [ 80:112) W1    (lanes 0:64 used)
#   [112]     b1
#   [120:248) W2    zero-padded to (128,128): rows 0:64 / lanes 0:32 used
#   [248]     b2
# Tail (after N_LAYERS*256 rows):
#   [ +0:+32) W_proj   [+32] b_proj   [+33] final ln_a   [+34] final ln_b
#   [+40:+44) per-head q masks (value 1/sqrt(dk) on lanes of head h, else 0)
#   [+44:+48) per-head v masks (value 1 on lanes of head h, else 0)
#   [+48:+64) cross-batch additive attention bias (TOKENS x TOKENS, lanes 0:16)
PER_LAYER_ROWS = 256
ROW_WQKV, ROW_BQKV, ROW_LN = 0, 32, 33
ROW_WO, ROW_BO = 40, 72
ROW_W1, ROW_B1 = 80, 112
ROW_W2, ROW_B2 = 120, 248
TAIL       = N_LAYERS * PER_LAYER_ROWS
ROW_WP     = TAIL
ROW_BP     = TAIL + 32
ROW_LNF_A  = TAIL + 33
ROW_LNF_B  = TAIL + 34
ROW_QMASK  = TAIL + 40
ROW_VMASK  = TAIL + 44
ROW_BIAS   = TAIL + 48
SLAB_ROWS  = TAIL + 64          # 576 rows -> (576,128) f32 = 288 KiB


# ---------------------------- layer-norm helpers ----------------------------------
def _layer_norm_in_kernel(x, a, b):
    """Annotated-Transformer LayerNorm (unbiased std); division -> pl.reciprocal."""
    mean = jnp.sum(x, axis=-1, keepdims=True) * (1.0 / x.shape[-1])
    var = jnp.sum((x - mean) ** 2, axis=-1, keepdims=True) * (1.0 / (x.shape[-1] - 1))
    std = jnp.sqrt(var)
    return (x - mean) * (a * pl.reciprocal(std + EPS_LN, approx=False)) + b


def _layer_norm_ref(x, a, b):
    mean = jnp.mean(x, axis=-1, keepdims=True)
    var = jnp.sum((x - mean) ** 2, axis=-1, keepdims=True) / (x.shape[-1] - 1)
    std = jnp.sqrt(var)
    return a * (x - mean) / (std + EPS_LN) + b


# ---------------------------------- Pallas kernel ----------------------------------
def encoder_class_kernel(x_ref, w_ref, out_ref):
    D, T = D_MODEL, TOKENS

    x = x_ref[...].reshape(T, D)                              # (16, 32) token slab

    # baked constants (zero VPU setup cost): cross-batch bias + per-head masks
    bias = w_ref[ROW_BIAS:ROW_BIAS + T, 0:T]                  # (16, 16)
    qmasks = w_ref[ROW_QMASK:ROW_QMASK + N_HEADS, 0:D]        # (4, 32), scale folded in
    vmasks = w_ref[ROW_VMASK:ROW_VMASK + N_HEADS, 0:D]        # (4, 32)

    for l in range(N_LAYERS):                                 # static unroll
        base = l * PER_LAYER_ROWS
        w_qkv = w_ref[base + ROW_WQKV:base + ROW_WQKV + D, :]     # (32, 128)
        b_qkv = w_ref[base + ROW_BQKV:base + ROW_BQKV + 1, :]     # (1, 128)
        ln_a0 = w_ref[base + ROW_LN + 0:base + ROW_LN + 1, 0:D]
        ln_b0 = w_ref[base + ROW_LN + 1:base + ROW_LN + 2, 0:D]
        ln_a1 = w_ref[base + ROW_LN + 2:base + ROW_LN + 3, 0:D]
        ln_b1 = w_ref[base + ROW_LN + 3:base + ROW_LN + 4, 0:D]
        w_o = w_ref[base + ROW_WO:base + ROW_WO + D, :]           # (32, 128) lane-padded
        b_o = w_ref[base + ROW_BO:base + ROW_BO + 1, :]
        w1 = w_ref[base + ROW_W1:base + ROW_W1 + D, :]            # (32, 128) lane-padded
        b1 = w_ref[base + ROW_B1:base + ROW_B1 + 1, :]
        w2 = w_ref[base + ROW_W2:base + ROW_W2 + FF_PAD, :]       # (128, 128) padded
        b2 = w_ref[base + ROW_B2:base + ROW_B2 + 1, :]

        # -------- self-attention sublayer: x + MHA(LN(x)) --------
        xn = _layer_norm_in_kernel(x, ln_a0, ln_b0)
        qkv = jnp.dot(xn, w_qkv, preferred_element_type=jnp.float32) + b_qkv  # (16,128)
        q = qkv[:, 0:D]
        k = qkv[:, D:2 * D]
        v = qkv[:, 2 * D:3 * D]

        ctx = jnp.zeros((T, D), jnp.float32)
        for h in range(N_HEADS):                              # static unroll over heads
            qh = q * qmasks[h:h + 1, :]                       # masked + pre-scaled
            vh = v * vmasks[h:h + 1, :]
            # scores_h = (q_h / sqrt(dk)) @ k_h^T  -> MXU, contraction over lanes
            s = jax.lax.dot_general(qh, k, (((1,), (1,)), ((), ())),
                                    preferred_element_type=jnp.float32)       # (16,16)
            s = s + bias                                      # mask cross-batch pairs
            m = jnp.max(s, axis=-1, keepdims=True)            # lane-axis reductions
            p = jnp.exp(s - m)
            attn = p * pl.reciprocal(jnp.sum(p, axis=-1, keepdims=True), approx=False)
            ctx = ctx + jnp.dot(attn, vh, preferred_element_type=jnp.float32)  # (16,32)

        attn_out = jnp.dot(ctx, w_o, preferred_element_type=jnp.float32) + b_o  # (16,128)
        x = x + attn_out[:, 0:D]

        # -------- feed-forward sublayer: x + FFN(LN(x)) --------
        xn = _layer_norm_in_kernel(x, ln_a1, ln_b1)
        hid = jnp.dot(xn, w1, preferred_element_type=jnp.float32) + b1         # (16,128)
        hid = jnp.maximum(hid, 0.0)
        ff = jnp.dot(hid, w2, preferred_element_type=jnp.float32) + b2         # (16,128)
        x = x + ff[:, 0:D]

    # -------- final encoder LayerNorm --------
    xf = _layer_norm_in_kernel(x,
                               w_ref[ROW_LNF_A:ROW_LNF_A + 1, 0:D],
                               w_ref[ROW_LNF_B:ROW_LNF_B + 1, 0:D])

    # -------- ProjectionHead: Linear + F.normalize(dim=1) (dim 1 == sequence axis) ----
    wp = w_ref[ROW_WP:ROW_WP + D, :]                                           # (32,128)
    bp = w_ref[ROW_BP:ROW_BP + 1, :]                                           # (1,128)
    proj = jnp.dot(xf, wp, preferred_element_type=jnp.float32) + bp            # (16,128)
    proj3 = proj.reshape(BATCH, SEQ, PROJ_DIM)
    norm = jnp.sqrt(jnp.sum(proj3 * proj3, axis=1, keepdims=True))             # (2,1,128)
    out_ref[...] = proj3 * pl.reciprocal(jnp.maximum(norm, EPS_NORM), approx=False)


# --------------------------- parameter packing (wrapper) ---------------------------
def pack_params(params):
    """Pack all parameters + baked constants into one lane-dense (SLAB_ROWS,128) slab."""
    (ln_a, ln_b, wqkvo, bqkvo, w1, b1, w2, b2, lnf_a, lnf_b, wp, bp) = params
    slab = jnp.zeros((SLAB_ROWS, 128), jnp.float32)
    for l in range(N_LAYERS):
        base = l * PER_LAYER_ROWS
        slab = slab.at[base:base + D_MODEL, 0:D_MODEL].set(wqkvo[l, 0])
        slab = slab.at[base:base + D_MODEL, D_MODEL:2 * D_MODEL].set(wqkvo[l, 1])
        slab = slab.at[base:base + D_MODEL, 2 * D_MODEL:3 * D_MODEL].set(wqkvo[l, 2])
        slab = slab.at[base + ROW_BQKV, 0:D_MODEL].set(bqkvo[l, 0])
        slab = slab.at[base + ROW_BQKV, D_MODEL:2 * D_MODEL].set(bqkvo[l, 1])
        slab = slab.at[base + ROW_BQKV, 2 * D_MODEL:3 * D_MODEL].set(bqkvo[l, 2])
        slab = slab.at[base + ROW_LN + 0, 0:D_MODEL].set(ln_a[l, 0])
        slab = slab.at[base + ROW_LN + 1, 0:D_MODEL].set(ln_b[l, 0])
        slab = slab.at[base + ROW_LN + 2, 0:D_MODEL].set(ln_a[l, 1])
        slab = slab.at[base + ROW_LN + 3, 0:D_MODEL].set(ln_b[l, 1])
        slab = slab.at[base + ROW_WO:base + ROW_WO + D_MODEL, 0:D_MODEL].set(wqkvo[l, 3])
        slab = slab.at[base + ROW_BO, 0:D_MODEL].set(bqkvo[l, 3])
        slab = slab.at[base + ROW_W1:base + ROW_W1 + D_MODEL, 0:D_FF].set(w1[l])
        slab = slab.at[base + ROW_B1, 0:D_FF].set(b1[l])
        slab = slab.at[base + ROW_W2:base + ROW_W2 + D_FF, 0:D_MODEL].set(w2[l])
        slab = slab.at[base + ROW_B2, 0:D_MODEL].set(b2[l])
    slab = slab.at[ROW_WP:ROW_WP + D_MODEL, :].set(wp)
    slab = slab.at[ROW_BP, :].set(bp[0])
    slab = slab.at[ROW_LNF_A, 0:D_MODEL].set(lnf_a[0])
    slab = slab.at[ROW_LNF_B, 0:D_MODEL].set(lnf_b[0])
    # baked per-head masks (q mask carries the 1/sqrt(dk) scale) and cross-batch bias
    lane = jnp.arange(D_MODEL)
    for h in range(N_HEADS):
        sel = (lane // D_HEAD) == h
        slab = slab.at[ROW_QMASK + h, 0:D_MODEL].set(
            jnp.where(sel, 1.0 / float(D_HEAD) ** 0.5, 0.0).astype(jnp.float32))
        slab = slab.at[ROW_VMASK + h, 0:D_MODEL].set(
            jnp.where(sel, 1.0, 0.0).astype(jnp.float32))
    tok = jnp.arange(TOKENS)
    bias = jnp.where((tok[:, None] // SEQ) == (tok[None, :] // SEQ), 0.0, NEG_INF)
    slab = slab.at[ROW_BIAS:ROW_BIAS + TOKENS, 0:TOKENS].set(bias.astype(jnp.float32))
    return slab


# ---------------------------------- wrapper ----------------------------------
def encoder_class_forward(src, tgt, slab):
    """Mirrors EncoderClass.forward(src, tgt): tgt is accepted but unused."""
    del tgt
    B, S, D = src.shape
    assert (B, S, D) == (BATCH, SEQ, D_MODEL)

    return pl.pallas_call(
        encoder_class_kernel,
        out_shape=jax.ShapeDtypeStruct((B, S, PROJ_DIM), jnp.float32),
        grid=(1,),  # single step: whole batch processed in one kernel invocation
        in_specs=[
            pl.BlockSpec((B, S, D), lambda i: (0, 0, 0)),
            pl.BlockSpec((SLAB_ROWS, 128), lambda i: (0, 0)),
        ],
        out_specs=pl.BlockSpec((B, S, PROJ_DIM), lambda i: (0, 0, 0)),
        compiler_params=pltpu.CompilerParams(dimension_semantics=("arbitrary",)),
    )(src, slab)


# ----------------------------- pure-JAX reference -----------------------------
def reference_forward(src, params):
    (ln_a, ln_b, wqkvo, bqkvo, w1, b1, w2, b2, lnf_a, lnf_b, wp, bp) = params
    B, S, D = src.shape
    with jax.default_matmul_precision("float32"):
        x = src
        for l in range(N_LAYERS):
            xn = _layer_norm_ref(x, ln_a[l, 0], ln_b[l, 0])
            q = (xn @ wqkvo[l, 0] + bqkvo[l, 0]).reshape(B, S, N_HEADS, D_HEAD)
            k = (xn @ wqkvo[l, 1] + bqkvo[l, 1]).reshape(B, S, N_HEADS, D_HEAD)
            v = (xn @ wqkvo[l, 2] + bqkvo[l, 2]).reshape(B, S, N_HEADS, D_HEAD)
            scores = jnp.einsum('bqhd,bkhd->bhqk', q, k) / (D_HEAD ** 0.5)
            attn = jax.nn.softmax(scores, axis=-1)
            ctx = jnp.einsum('bhqk,bkhd->bqhd', attn, v).reshape(B, S, D)
            x = x + (ctx @ wqkvo[l, 3] + bqkvo[l, 3])
            xn = _layer_norm_ref(x, ln_a[l, 1], ln_b[l, 1])
            x = x + (jnp.maximum(xn @ w1[l] + b1[l], 0.0) @ w2[l] + b2[l])
        xf = _layer_norm_ref(x, lnf_a[0], lnf_b[0])
        proj = xf @ wp + bp[0]
        norm = jnp.maximum(jnp.sqrt(jnp.sum(proj * proj, axis=1, keepdims=True)), EPS_NORM)
        return proj / norm


# ----------------------------- parameter construction -----------------------------
def init_params(key):
    ks = jax.random.split(key, 8)
    s = 0.1
    ln_a = jnp.ones((N_LAYERS, 2, D_MODEL), jnp.float32)
    ln_b = jnp.zeros((N_LAYERS, 2, D_MODEL), jnp.float32)
    wqkvo = s * jax.random.normal(ks[0], (N_LAYERS, 4, D_MODEL, D_MODEL), jnp.float32)
    bqkvo = s * jax.random.normal(ks[1], (N_LAYERS, 4, D_MODEL), jnp.float32)
    w1 = s * jax.random.normal(ks[2], (N_LAYERS, D_MODEL, D_FF), jnp.float32)
    b1 = s * jax.random.normal(ks[3], (N_LAYERS, D_FF), jnp.float32)
    w2 = s * jax.random.normal(ks[4], (N_LAYERS, D_FF, D_MODEL), jnp.float32)
    b2 = s * jax.random.normal(ks[5], (N_LAYERS, D_MODEL), jnp.float32)
    lnf_a = jnp.ones((1, D_MODEL), jnp.float32)
    lnf_b = jnp.zeros((1, D_MODEL), jnp.float32)
    wp = s * jax.random.normal(ks[6], (D_MODEL, PROJ_DIM), jnp.float32)
    bp = s * jax.random.normal(ks[7], (1, PROJ_DIM), jnp.float32)
    return (ln_a, ln_b, wqkvo, bqkvo, w1, b1, w2, b2, lnf_a, lnf_b, wp, bp)


if __name__ == "__main__":
    key = jax.random.PRNGKey(0)
    k_params, k_src, k_tgt = jax.random.split(key, 3)
    params = init_params(k_params)
    slab = pack_params(params)                    # packed once, outside the hot path
    src = jax.random.normal(k_src, (BATCH, SEQ, D_MODEL), jnp.float32)
    tgt = jax.random.normal(k_tgt, (BATCH, SEQ, D_MODEL), jnp.float32)  # unused (as in PyTorch)

    out = jax.block_until_ready(encoder_class_forward(src, tgt, slab))
    ref = jax.block_until_ready(reference_forward(src, params))

    assert out.shape == (BATCH, SEQ, PROJ_DIM)
    if not jnp.allclose(out, ref, rtol=1e-4, atol=1e-4):
        max_err = float(jnp.max(jnp.abs(out - ref)))
        raise AssertionError(f"Pallas kernel output does not match JAX reference (max err {max_err})")

    print("KERNEL_OK")
</pallas_src>

<mosaic_0001>
module attributes {stable_mosaic.version = 11 : i64} {
  func.func @encoder_class_kernel(%arg0: i32, %arg1: memref<2x8x32xf32, #tpu.memory_space<vmem>>, %arg2: memref<576x128xf32, #tpu.memory_space<vmem>>, %arg3: memref<2x8x128xf32, #tpu.memory_space<vmem>>) attributes {dimension_semantics = [#tpu.dimension_semantics<arbitrary>], iteration_bounds = array<i64: 1>, scalar_prefetch = 0 : i64, scratch_operands = 0 : i64, tpu.core_type = #tpu.core_type<tc>, window_params = [{pipeline_mode = #tpu.pipeline_mode<synchronous>, transform_indices = @transform_0, window_bounds = array<i64: 2, 8, 32>}, {pipeline_mode = #tpu.pipeline_mode<synchronous>, transform_indices = @transform_1, window_bounds = array<i64: 576, 128>}, {pipeline_mode = #tpu.pipeline_mode<synchronous>, transform_indices = @transform_2, window_bounds = array<i64: 2, 8, 128>}]} {
    %c0 = arith.constant 0 : index
    %c0_0 = arith.constant 0 : index
    %c0_1 = arith.constant 0 : index
    %0 = vector.load %arg1[%c0, %c0_0, %c0_1] : memref<2x8x32xf32, #tpu.memory_space<vmem>>, vector<2x8x32xf32>
    %1 = vector.shape_cast %0 : vector<2x8x32xf32> to vector<16x32xf32>
    %c560 = arith.constant 560 : index
    %c0_2 = arith.constant 0 : index
    %2 = vector.load %arg2[%c560, %c0_2] : memref<576x128xf32, #tpu.memory_space<vmem>>, vector<16x16xf32>
    %c552 = arith.constant 552 : index
    %c0_3 = arith.constant 0 : index
    %3 = vector.load %arg2[%c552, %c0_3] : memref<576x128xf32, #tpu.memory_space<vmem>>, vector<4x32xf32>
    %c556 = arith.constant 556 : index
    %c0_4 = arith.constant 0 : index
    %4 = vector.load %arg2[%c556, %c0_4] : memref<576x128xf32, #tpu.memory_space<vmem>>, vector<4x32xf32>
    %c0_5 = arith.constant 0 : index
    %c0_6 = arith.constant 0 : index
    %5 = vector.load %arg2[%c0_5, %c0_6] : memref<576x128xf32, #tpu.memory_space<vmem>>, vector<32x128xf32>
    %c32 = arith.constant 32 : index
    %c0_7 = arith.constant 0 : index
    %6 = vector.load %arg2[%c32, %c0_7] : memref<576x128xf32, #tpu.memory_space<vmem>>, vector<1x128xf32>
    %c33 = arith.constant 33 : index
    %c0_8 = arith.constant 0 : index
    %7 = vector.load %arg2[%c33, %c0_8] : memref<576x128xf32, #tpu.memory_space<vmem>>, vector<1x32xf32>
    %c34 = arith.constant 34 : index
    %c0_9 = arith.constant 0 : index
    %8 = vector.load %arg2[%c34, %c0_9] : memref<576x128xf32, #tpu.memory_space<vmem>>, vector<1x32xf32>
    %c35 = arith.constant 35 : index
    %c0_10 = arith.constant 0 : index
    %9 = vector.load %arg2[%c35, %c0_10] : memref<576x128xf32, #tpu.memory_space<vmem>>, vector<1x32xf32>
    %c36 = arith.constant 36 : index
    %c0_11 = arith.constant 0 : index
    %10 = vector.load %arg2[%c36, %c0_11] : memref<576x128xf32, #tpu.memory_space<vmem>>, vector<1x32xf32>
    %c40 = arith.constant 40 : index
    %c0_12 = arith.constant 0 : index
    %11 = vector.load %arg2[%c40, %c0_12] : memref<576x128xf32, #tpu.memory_space<vmem>>, vector<32x128xf32>
    %c72 = arith.constant 72 : index
    %c0_13 = arith.constant 0 : index
    %12 = vector.load %arg2[%c72, %c0_13] : memref<576x128xf32, #tpu.memory_space<vmem>>, vector<1x128xf32>
    %c80 = arith.constant 80 : index
    %c0_14 = arith.constant 0 : index
    %13 = vector.load %arg2[%c80, %c0_14] : memref<576x128xf32, #tpu.memory_space<vmem>>, vector<32x128xf32>
    %c112 = arith.constant 112 : index
    %c0_15 = arith.constant 0 : index
    %14 = vector.load %arg2[%c112, %c0_15] : memref<576x128xf32, #tpu.memory_space<vmem>>, vector<1x128xf32>
    %c120 = arith.constant 120 : index
    %c0_16 = arith.constant 0 : index
    %15 = vector.load %arg2[%c120, %c0_16] : memref<576x128xf32, #tpu.memory_space<vmem>>, vector<128x128xf32>
    %c248 = arith.constant 248 : index
    %c0_17 = arith.constant 0 : index
    %16 = vector.load %arg2[%c248, %c0_17] : memref<576x128xf32, #tpu.memory_space<vmem>>, vector<1x128xf32>
    %cst = arith.constant dense<0.000000e+00> : vector<16xf32>
    %17 = vector.multi_reduction <add>, %1, %cst [1] : vector<16x32xf32> to vector<16xf32>
    %18 = vector.shape_cast %17 : vector<16xf32> to vector<16x1xf32>
    %cst_18 = arith.constant 3.125000e-02 : f32
    %19 = vector.broadcast %cst_18 : f32 to vector<16x1xf32>
    %20 = arith.mulf %18, %19 : vector<16x1xf32>
    %21 = vector.broadcast %20 : vector<16x1xf32> to vector<16x32xf32>
    %22 = arith.subf %1, %21 : vector<16x32xf32>
    %23 = arith.mulf %22, %22 : vector<16x32xf32>
    %cst_19 = arith.constant dense<0.000000e+00> : vector<16xf32>
    %24 = vector.multi_reduction <add>, %23, %cst_19 [1] : vector<16x32xf32> to vector<16xf32>
    %25 = vector.shape_cast %24 : vector<16xf32> to vector<16x1xf32>
    %cst_20 = arith.constant 0.0322580636 : f32
    %26 = vector.broadcast %cst_20 : f32 to vector<16x1xf32>
    %27 = arith.mulf %25, %26 : vector<16x1xf32>
    %28 = math.sqrt %27 : vector<16x1xf32>
    %29 = vector.broadcast %20 : vector<16x1xf32> to vector<16x32xf32>
    %30 = arith.subf %1, %29 : vector<16x32xf32>
    %cst_21 = arith.constant 9.99999997E-7 : f32
    %31 = vector.broadcast %cst_21 : f32 to vector<16x1xf32>
    %32 = arith.addf %28, %31 : vector<16x1xf32>
    %33 = tpu.reciprocal %32 : vector<16x1xf32> -> vector<16x1xf32>
    %34 = vector.broadcast %7 : vector<1x32xf32> to vector<16x32xf32>
    %35 = vector.broadcast %33 : vector<16x1xf32> to vector<16x32xf32>
    %36 = arith.mulf %34, %35 : vector<16x32xf32>
    %37 = arith.mulf %30, %36 : vector<16x32xf32>
    %38 = vector.broadcast %8 : vector<1x32xf32> to vector<16x32xf32>
    %39 = arith.addf %37, %38 : vector<16x32xf32>
    %cst_22 = arith.constant dense<0.000000e+00> : vector<16x128xf32>
    %40 = tpu.matmul %39, %5, %cst_22 {dimension_numbers = #tpu.dot_dimension_numbers<[1], [0], [0], [1], [0, 0, 1, 1], [], []>} : vector<16x32xf32>, vector<32x128xf32>, vector<16x128xf32> -> vector<16x128xf32>
    %41 = vector.broadcast %6 : vector<1x128xf32> to vector<16x128xf32>
    %42 = arith.addf %40, %41 : vector<16x128xf32>
    %43 = vector.extract_strided_slice %42 {offsets = [0, 0], sizes = [16, 32], strides = [1, 1]} : vector<16x128xf32> to vector<16x32xf32>
    %44 = vector.extract_strided_slice %42 {offsets = [0, 32], sizes = [16, 32], strides = [1, 1]} : vector<16x128xf32> to vector<16x32xf32>
    %45 = vector.extract_strided_slice %42 {offsets = [0, 64], sizes = [16, 32], strides = [1, 1]} : vector<16x128xf32> to vector<16x32xf32>
    %cst_23 = arith.constant 0.000000e+00 : f32
    %46 = vector.broadcast %cst_23 : f32 to vector<16x32xf32>
    %47 = vector.extract_strided_slice %3 {offsets = [0, 0], sizes = [1, 32], strides = [1, 1]} : vector<4x32xf32> to vector<1x32xf32>
    %48 = vector.broadcast %47 : vector<1x32xf32> to vector<16x32xf32>
    %49 = arith.mulf %43, %48 : vector<16x32xf32>
    %50 = vector.extract_strided_slice %4 {offsets = [0, 0], sizes = [1, 32], strides = [1, 1]} : vector<4x32xf32> to vector<1x32xf32>
    %51 = vector.broadcast %50 : vector<1x32xf32> to vector<16x32xf32>
    %52 = arith.mulf %45, %51 : vector<16x32xf32>
    %cst_24 = arith.constant dense<0.000000e+00> : vector<16x16xf32>
    %53 = tpu.matmul %49, %44, %cst_24 {dimension_numbers = #tpu.dot_dimension_numbers<[1], [1], [0], [0], [0, 0, 1, 0], [], []>} : vector<16x32xf32>, vector<16x32xf32>, vector<16x16xf32> -> vector<16x16xf32>
    %54 = arith.addf %53, %2 : vector<16x16xf32>
    %cst_25 = arith.constant dense<0xFF800000> : vector<16xf32>
    %55 = vector.multi_reduction <maximumf>, %54, %cst_25 [1] : vector<16x16xf32> to vector<16xf32>
    %56 = vector.shape_cast %55 : vector<16xf32> to vector<16x1xf32>
    %57 = vector.broadcast %56 : vector<16x1xf32> to vector<16x16xf32>
    %58 = arith.subf %54, %57 : vector<16x16xf32>
    %59 = math.exp %58 : vector<16x16xf32>
    %cst_26 = arith.constant dense<0.000000e+00> : vector<16xf32>
    %60 = vector.multi_reduction <add>, %59, %cst_26 [1] : vector<16x16xf32> to vector<16xf32>
    %61 = vector.shape_cast %60 : vector<16xf32> to vector<16x1xf32>
    %62 = tpu.reciprocal %61 : vector<16x1xf32> -> vector<16x1xf32>
    %63 = vector.broadcast %62 : vector<16x1xf32> to vector<16x16xf32>
    %64 = arith.mulf %59, %63 : vector<16x16xf32>
    %cst_27 = arith.constant dense<0.000000e+00> : vector<16x32xf32>
    %65 = tpu.matmul %64, %52, %cst_27 {dimension_numbers = #tpu.dot_dimension_numbers<[1], [0], [0], [1], [0, 0, 1, 1], [], []>} : vector<16x16xf32>, vector<16x32xf32>, vector<16x32xf32> -> vector<16x32xf32>
    %66 = arith.addf %46, %65 : vector<16x32xf32>
    %67 = vector.extract_strided_slice %3 {offsets = [1, 0], sizes = [1, 32], strides = [1, 1]} : vector<4x32xf32> to vector<1x32xf32>
    %68 = vector.broadcast %67 : vector<1x32xf32> to vector<16x32xf32>
    %69 = arith.mulf %43, %68 : vector<16x32xf32>
    %70 = vector.extract_strided_slice %4 {offsets = [1, 0], sizes = [1, 32], strides = [1, 1]} : vector<4x32xf32> to vector<1x32xf32>
    %71 = vector.broadcast %70 : vector<1x32xf32> to vector<16x32xf32>
    %72 = arith.mulf %45, %71 : vector<16x32xf32>
    %cst_28 = arith.constant dense<0.000000e+00> : vector<16x16xf32>
    %73 = tpu.matmul %69, %44, %cst_28 {dimension_numbers = #tpu.dot_dimension_numbers<[1], [1], [0], [0], [0, 0, 1, 0], [], []>} : vector<16x32xf32>, vector<16x32xf32>, vector<16x16xf32> -> vector<16x16xf32>
    %74 = arith.addf %73, %2 : vector<16x16xf32>
    %cst_29 = arith.constant dense<0xFF800000> : vector<16xf32>
    %75 = vector.multi_reduction <maximumf>, %74, %cst_29 [1] : vector<16x16xf32> to vector<16xf32>
    %76 = vector.shape_cast %75 : vector<16xf32> to vector<16x1xf32>
    %77 = vector.broadcast %76 : vector<16x1xf32> to vector<16x16xf32>
    %78 = arith.subf %74, %77 : vector<16x16xf32>
    %79 = math.exp %78 : vector<16x16xf32>
    %cst_30 = arith.constant dense<0.000000e+00> : vector<16xf32>
    %80 = vector.multi_reduction <add>, %79, %cst_30 [1] : vector<16x16xf32> to vector<16xf32>
    %81 = vector.shape_cast %80 : vector<16xf32> to vector<16x1xf32>
    %82 = tpu.reciprocal %81 : vector<16x1xf32> -> vector<16x1xf32>
    %83 = vector.broadcast %82 : vector<16x1xf32> to vector<16x16xf32>
    %84 = arith.mulf %79, %83 : vector<16x16xf32>
    %cst_31 = arith.constant dense<0.000000e+00> : vector<16x32xf32>
    %85 = tpu.matmul %84, %72, %cst_31 {dimension_numbers = #tpu.dot_dimension_numbers<[1], [0], [0], [1], [0, 0, 1, 1], [], []>} : vector<16x16xf32>, vector<16x32xf32>, vector<16x32xf32> -> vector<16x32xf32>
    %86 = arith.addf %66, %85 : vector<16x32xf32>
    %87 = vector.extract_strided_slice %3 {offsets = [2, 0], sizes = [1, 32], strides = [1, 1]} : vector<4x32xf32> to vector<1x32xf32>
    %88 = vector.broadcast %87 : vector<1x32xf32> to vector<16x32xf32>
    %89 = arith.mulf %43, %88 : vector<16x32xf32>
    %90 = vector.extract_strided_slice %4 {offsets = [2, 0], sizes = [1, 32], strides = [1, 1]} : vector<4x32xf32> to vector<1x32xf32>
    %91 = vector.broadcast %90 : vector<1x32xf32> to vector<16x32xf32>
    %92 = arith.mulf %45, %91 : vector<16x32xf32>
    %cst_32 = arith.constant dense<0.000000e+00> : vector<16x16xf32>
    %93 = tpu.matmul %89, %44, %cst_32 {dimension_numbers = #tpu.dot_dimension_numbers<[1], [1], [0], [0], [0, 0, 1, 0], [], []>} : vector<16x32xf32>, vector<16x32xf32>, vector<16x16xf32> -> vector<16x16xf32>
    %94 = arith.addf %93, %2 : vector<16x16xf32>
    %cst_33 = arith.constant dense<0xFF800000> : vector<16xf32>
    %95 = vector.multi_reduction <maximumf>, %94, %cst_33 [1] : vector<16x16xf32> to vector<16xf32>
    %96 = vector.shape_cast %95 : vector<16xf32> to vector<16x1xf32>
    %97 = vector.broadcast %96 : vector<16x1xf32> to vector<16x16xf32>
    %98 = arith.subf %94, %97 : vector<16x16xf32>
    %99 = math.exp %98 : vector<16x16xf32>
    %cst_34 = arith.constant dense<0.000000e+00> : vector<16xf32>
    %100 = vector.multi_reduction <add>, %99, %cst_34 [1] : vector<16x16xf32> to vector<16xf32>
    %101 = vector.shape_cast %100 : vector<16xf32> to vector<16x1xf32>
    %102 = tpu.reciprocal %101 : vector<16x1xf32> -> vector<16x1xf32>
    %103 = vector.broadcast %102 : vector<16x1xf32> to vector<16x16xf32>
    %104 = arith.mulf %99, %103 : vector<16x16xf32>
    %cst_35 = arith.constant dense<0.000000e+00> : vector<16x32xf32>
    %105 = tpu.matmul %104, %92, %cst_35 {dimension_numbers = #tpu.dot_dimension_numbers<[1], [0], [0], [1], [0, 0, 1, 1], [], []>} : vector<16x16xf32>, vector<16x32xf32>, vector<16x32xf32> -> vector<16x32xf32>
    %106 = arith.addf %86, %105 : vector<16x32xf32>
    %107 = vector.extract_strided_slice %3 {offsets = [3, 0], sizes = [1, 32], strides = [1, 1]} : vector<4x32xf32> to vector<1x32xf32>
    %108 = vector.broadcast %107 : vector<1x32xf32> to vector<16x32xf32>
    %109 = arith.mulf %43, %108 : vector<16x32xf32>
    %110 = vector.extract_strided_slice %4 {offsets = [3, 0], sizes = [1, 32], strides = [1, 1]} : vector<4x32xf32> to vector<1x32xf32>
    %111 = vector.broadcast %110 : vector<1x32xf32> to vector<16x32xf32>
    %112 = arith.mulf %45, %111 : vector<16x32xf32>
    %cst_36 = arith.constant dense<0.000000e+00> : vector<16x16xf32>
    %113 = tpu.matmul %109, %44, %cst_36 {dimension_numbers = #tpu.dot_dimension_numbers<[1], [1], [0], [0], [0, 0, 1, 0], [], []>} : vector<16x32xf32>, vector<16x32xf32>, vector<16x16xf32> -> vector<16x16xf32>
    %114 = arith.addf %113, %2 : vector<16x16xf32>
    %cst_37 = arith.constant dense<0xFF800000> : vector<16xf32>
    %115 = vector.multi_reduction <maximumf>, %114, %cst_37 [1] : vector<16x16xf32> to vector<16xf32>
    %116 = vector.shape_cast %115 : vector<16xf32> to vector<16x1xf32>
    %117 = vector.broadcast %116 : vector<16x1xf32> to vector<16x16xf32>
    %118 = arith.subf %114, %117 : vector<16x16xf32>
    %119 = math.exp %118 : vector<16x16xf32>
    %cst_38 = arith.constant dense<0.000000e+00> : vector<16xf32>
    %120 = vector.multi_reduction <add>, %119, %cst_38 [1] : vector<16x16xf32> to vector<16xf32>
    %121 = vector.shape_cast %120 : vector<16xf32> to vector<16x1xf32>
    %122 = tpu.reciprocal %121 : vector<16x1xf32> -> vector<16x1xf32>
    %123 = vector.broadcast %122 : vector<16x1xf32> to vector<16x16xf32>
    %124 = arith.mulf %119, %123 : vector<16x16xf32>
    %cst_39 = arith.constant dense<0.000000e+00> : vector<16x32xf32>
    %125 = tpu.matmul %124, %112, %cst_39 {dimension_numbers = #tpu.dot_dimension_numbers<[1], [0], [0], [1], [0, 0, 1, 1], [], []>} : vector<16x16xf32>, vector<16x32xf32>, vector<16x32xf32> -> vector<16x32xf32>
    %126 = arith.addf %106, %125 : vector<16x32xf32>
    %cst_40 = arith.constant dense<0.000000e+00> : vector<16x128xf32>
    %127 = tpu.matmul %126, %11, %cst_40 {dimension_numbers = #tpu.dot_dimension_numbers<[1], [0], [0], [1], [0, 0, 1, 1], [], []>} : vector<16x32xf32>, vector<32x128xf32>, vector<16x128xf32> -> vector<16x128xf32>
    %128 = vector.broadcast %12 : vector<1x128xf32> to vector<16x128xf32>
    %129 = arith.addf %127, %128 : vector<16x128xf32>
    %130 = vector.extract_strided_slice %129 {offsets = [0, 0], sizes = [16, 32], strides = [1, 1]} : vector<16x128xf32> to vector<16x32xf32>
    %131 = arith.addf %1, %130 : vector<16x32xf32>
    %cst_41 = arith.constant dense<0.000000e+00> : vector<16xf32>
    %132 = vector.multi_reduction <add>, %131, %cst_41 [1] : vector<16x32xf32> to vector<16xf32>
    %133 = vector.shape_cast %132 : vector<16xf32> to vector<16x1xf32>
    %cst_42 = arith.constant 3.125000e-02 : f32
    %134 = vector.broadcast %cst_42 : f32 to vector<16x1xf32>
    %135 = arith.mulf %133, %134 : vector<16x1xf32>
    %136 = vector.broadcast %135 : vector<16x1xf32> to vector<16x32xf32>
    %137 = arith.subf %131, %136 : vector<16x32xf32>
    %138 = arith.mulf %137, %137 : vector<16x32xf32>
    %cst_43 = arith.constant dense<0.000000e+00> : vector<16xf32>
    %139 = vector.multi_reduction <add>, %138, %cst_43 [1] : vector<16x32xf32> to vector<16xf32>
    %140 = vector.shape_cast %139 : vector<16xf32> to vector<16x1xf32>
    %cst_44 = arith.constant 0.0322580636 : f32
    %141 = vector.broadcast %cst_44 : f32 to vector<16x1xf32>
    %142 = arith.mulf %140, %141 : vector<16x1xf32>
    %143 = math.sqrt %142 : vector<16x1xf32>
    %144 = vector.broadcast %135 : vector<16x1xf32> to vector<16x32xf32>
    %145 = arith.subf %131, %144 : vector<16x32xf32>
    %cst_45 = arith.constant 9.99999997E-7 : f32
    %146 = vector.broadcast %cst_45 : f32 to vector<16x1xf32>
    %147 = arith.addf %143, %146 : vector<16x1xf32>
    %148 = tpu.reciprocal %147 : vector<16x1xf32> -> vector<16x1xf32>
    %149 = vector.broadcast %9 : vector<1x32xf32> to vector<16x32xf32>
    %150 = vector.broadcast %148 : vector<16x1xf32> to vector<16x32xf32>
    %151 = arith.mulf %149, %150 : vector<16x32xf32>
    %152 = arith.mulf %145, %151 : vector<16x32xf32>
    %153 = vector.broadcast %10 : vector<1x32xf32> to vector<16x32xf32>
    %154 = arith.addf %152, %153 : vector<16x32xf32>
    %cst_46 = arith.constant dense<0.000000e+00> : vector<16x128xf32>
    %155 = tpu.matmul %154, %13, %cst_46 {dimension_numbers = #tpu.dot_dimension_numbers<[1], [0], [0], [1], [0, 0, 1, 1], [], []>} : vector<16x32xf32>, vector<32x128xf32>, vector<16x128xf32> -> vector<16x128xf32>
    %156 = vector.broadcast %14 : vector<1x128xf32> to vector<16x128xf32>
    %157 = arith.addf %155, %156 : vector<16x128xf32>
    %cst_47 = arith.constant 0.000000e+00 : f32
    %158 = vector.broadcast %cst_47 : f32 to vector<16x128xf32>
    %159 = arith.maximumf %157, %158 : vector<16x128xf32>
    %cst_48 = arith.constant dense<0.000000e+00> : vector<16x128xf32>
    %160 = tpu.matmul %159, %15, %cst_48 {dimension_numbers = #tpu.dot_dimension_numbers<[1], [0], [0], [1], [0, 0, 1, 1], [], []>} : vector<16x128xf32>, vector<128x128xf32>, vector<16x128xf32> -> vector<16x128xf32>
    %161 = vector.broadcast %16 : vector<1x128xf32> to vector<16x128xf32>
    %162 = arith.addf %160, %161 : vector<16x128xf32>
    %163 = vector.extract_strided_slice %162 {offsets = [0, 0], sizes = [16, 32], strides = [1, 1]} : vector<16x128xf32> to vector<16x32xf32>
    %164 = arith.addf %131, %163 : vector<16x32xf32>
    %c256 = arith.constant 256 : index
    %c0_49 = arith.constant 0 : index
    %165 = vector.load %arg2[%c256, %c0_49] : memref<576x128xf32, #tpu.memory_space<vmem>>, vector<32x128xf32>
    %c288 = arith.constant 288 : index
    %c0_50 = arith.constant 0 : index
    %166 = vector.load %arg2[%c288, %c0_50] : memref<576x128xf32, #tpu.memory_space<vmem>>, vector<1x128xf32>
    %c289 = arith.constant 289 : index
    %c0_51 = arith.constant 0 : index
    %167 = vector.load %arg2[%c289, %c0_51] : memref<576x128xf32, #tpu.memory_space<vmem>>, vector<1x32xf32>
    %c290 = arith.constant 290 : index
    %c0_52 = arith.constant 0 : index
    %168 = vector.load %arg2[%c290, %c0_52] : memref<576x128xf32, #tpu.memory_space<vmem>>, vector<1x32xf32>
    %c291 = arith.constant 291 : index
    %c0_53 = arith.constant 0 : index
    %169 = vector.load %arg2[%c291, %c0_53] : memref<576x128xf32, #tpu.memory_space<vmem>>, vector<1x32xf32>
    %c292 = arith.constant 292 : index
    %c0_54 = arith.constant 0 : index
    %170 = vector.load %arg2[%c292, %c0_54] : memref<576x128xf32, #tpu.memory_space<vmem>>, vector<1x32xf32>
    %c296 = arith.constant 296 : index
    %c0_55 = arith.constant 0 : index
    %171 = vector.load %arg2[%c296, %c0_55] : memref<576x128xf32, #tpu.memory_space<vmem>>, vector<32x128xf32>
    %c328 = arith.constant 328 : index
    %c0_56 = arith.constant 0 : index
    %172 = vector.load %arg2[%c328, %c0_56] : memref<576x128xf32, #tpu.memory_space<vmem>>, vector<1x128xf32>
    %c336 = arith.constant 336 : index
    %c0_57 = arith.constant 0 : index
    %173 = vector.load %arg2[%c336, %c0_57] : memref<576x128xf32, #tpu.memory_space<vmem>>, vector<32x128xf32>
    %c368 = arith.constant 368 : index
    %c0_58 = arith.constant 0 : index
    %174 = vector.load %arg2[%c368, %c0_58] : memref<576x128xf32, #tpu.memory_space<vmem>>, vector<1x128xf32>
    %c376 = arith.constant 376 : index
    %c0_59 = arith.constant 0 : index
    %175 = vector.load %arg2[%c376, %c0_59] : memref<576x128xf32, #tpu.memory_space<vmem>>, vector<128x128xf32>
    %c504 = arith.constant 504 : index
    %c0_60 = arith.constant 0 : index
    %176 = vector.load %arg2[%c504, %c0_60] : memref<576x128xf32, #tpu.memory_space<vmem>>, vector<1x128xf32>
    %cst_61 = arith.constant dense<0.000000e+00> : vector<16xf32>
    %177 = vector.multi_reduction <add>, %164, %cst_61 [1] : vector<16x32xf32> to vector<16xf32>
    %178 = vector.shape_cast %177 : vector<16xf32> to vector<16x1xf32>
    %cst_62 = arith.constant 3.125000e-02 : f32
    %179 = vector.broadcast %cst_62 : f32 to vector<16x1xf32>
    %180 = arith.mulf %178, %179 : vector<16x1xf32>
    %181 = vector.broadcast %180 : vector<16x1xf32> to vector<16x32xf32>
    %182 = arith.subf %164, %181 : vector<16x32xf32>
    %183 = arith.mulf %182, %182 : vector<16x32xf32>
    %cst_63 = arith.constant dense<0.000000e+00> : vector<16xf32>
    %184 = vector.multi_reduction <add>, %183, %cst_63 [1] : vector<16x32xf32> to vector<16xf32>
    %185 = vector.shape_cast %184 : vector<16xf32> to vector<16x1xf32>
    %cst_64 = arith.constant 0.0322580636 : f32
    %186 = vector.broadcast %cst_64 : f32 to vector<16x1xf32>
    %187 = arith.mulf %185, %186 : vector<16x1xf32>
    %188 = math.sqrt %187 : vector<16x1xf32>
    %189 = vector.broadcast %180 : vector<16x1xf32> to vector<16x32xf32>
    %190 = arith.subf %164, %189 : vector<16x32xf32>
    %cst_65 = arith.constant 9.99999997E-7 : f32
    %191 = vector.broadcast %cst_65 : f32 to vector<16x1xf32>
    %192 = arith.addf %188, %191 : vector<16x1xf32>
    %193 = tpu.reciprocal %192 : vector<16x1xf32> -> vector<16x1xf32>
    %194 = vector.broadcast %167 : vector<1x32xf32> to vector<16x32xf32>
    %195 = vector.broadcast %193 : vector<16x1xf32> to vector<16x32xf32>
    %196 = arith.mulf %194, %195 : vector<16x32xf32>
    %197 = arith.mulf %190, %196 : vector<16x32xf32>
    %198 = vector.broadcast %168 : vector<1x32xf32> to vector<16x32xf32>
    %199 = arith.addf %197, %198 : vector<16x32xf32>
    %cst_66 = arith.constant dense<0.000000e+00> : vector<16x128xf32>
    %200 = tpu.matmul %199, %165, %cst_66 {dimension_numbers = #tpu.dot_dimension_numbers<[1], [0], [0], [1], [0, 0, 1, 1], [], []>} : vector<16x32xf32>, vector<32x128xf32>, vector<16x128xf32> -> vector<16x128xf32>
    %201 = vector.broadcast %166 : vector<1x128xf32> to vector<16x128xf32>
    %202 = arith.addf %200, %201 : vector<16x128xf32>
    %203 = vector.extract_strided_slice %202 {offsets = [0, 0], sizes = [16, 32], strides = [1, 1]} : vector<16x128xf32> to vector<16x32xf32>
    %204 = vector.extract_strided_slice %202 {offsets = [0, 32], sizes = [16, 32], strides = [1, 1]} : vector<16x128xf32> to vector<16x32xf32>
    %205 = vector.extract_strided_slice %202 {offsets = [0, 64], sizes = [16, 32], strides = [1, 1]} : vector<16x128xf32> to vector<16x32xf32>
    %cst_67 = arith.constant 0.000000e+00 : f32
    %206 = vector.broadcast %cst_67 : f32 to vector<16x32xf32>
    %207 = vector.extract_strided_slice %3 {offsets = [0, 0], sizes = [1, 32], strides = [1, 1]} : vector<4x32xf32> to vector<1x32xf32>
    %208 = vector.broadcast %207 : vector<1x32xf32> to vector<16x32xf32>
    %209 = arith.mulf %203, %208 : vector<16x32xf32>
    %210 = vector.extract_strided_slice %4 {offsets = [0, 0], sizes = [1, 32], strides = [1, 1]} : vector<4x32xf32> to vector<1x32xf32>
    %211 = vector.broadcast %210 : vector<1x32xf32> to vector<16x32xf32>
    %212 = arith.mulf %205, %211 : vector<16x32xf32>
    %cst_68 = arith.constant dense<0.000000e+00> : vector<16x16xf32>
    %213 = tpu.matmul %209, %204, %cst_68 {dimension_numbers = #tpu.dot_dimension_numbers<[1], [1], [0], [0], [0, 0, 1, 0], [], []>} : vector<16x32xf32>, vector<16x32xf32>, vector<16x16xf32> -> vector<16x16xf32>
    %214 = arith.addf %213, %2 : vector<16x16xf32>
    %cst_69 = arith.constant dense<0xFF800000> : vector<16xf32>
    %215 = vector.multi_reduction <maximumf>, %214, %cst_69 [1] : vector<16x16xf32> to vector<16xf32>
    %216 = vector.shape_cast %215 : vector<16xf32> to vector<16x1xf32>
    %217 = vector.broadcast %216 : vector<16x1xf32> to vector<16x16xf32>
    %218 = arith.subf %214, %217 : vector<16x16xf32>
    %219 = math.exp %218 : vector<16x16xf32>
    %cst_70 = arith.constant dense<0.000000e+00> : vector<16xf32>
    %220 = vector.multi_reduction <add>, %219, %cst_70 [1] : vector<16x16xf32> to vector<16xf32>
    %221 = vector.shape_cast %220 : vector<16xf32> to vector<16x1xf32>
    %222 = tpu.reciprocal %221 : vector<16x1xf32> -> vector<16x1xf32>
    %223 = vector.broadcast %222 : vector<16x1xf32> to vector<16x16xf32>
    %224 = arith.mulf %219, %223 : vector<16x16xf32>
    %cst_71 = arith.constant dense<0.000000e+00> : vector<16x32xf32>
    %225 = tpu.matmul %224, %212, %cst_71 {dimension_numbers = #tpu.dot_dimension_numbers<[1], [0], [0], [1], [0, 0, 1, 1], [], []>} : vector<16x16xf32>, vector<16x32xf32>, vector<16x32xf32> -> vector<16x32xf32>
    %226 = arith.addf %206, %225 : vector<16x32xf32>
    %227 = vector.extract_strided_slice %3 {offsets = [1, 0], sizes = [1, 32], strides = [1, 1]} : vector<4x32xf32> to vector<1x32xf32>
    %228 = vector.broadcast %227 : vector<1x32xf32> to vector<16x32xf32>
    %229 = arith.mulf %203, %228 : vector<16x32xf32>
    %230 = vector.extract_strided_slice %4 {offsets = [1, 0], sizes = [1, 32], strides = [1, 1]} : vector<4x32xf32> to vector<1x32xf32>
    %231 = vector.broadcast %230 : vector<1x32xf32> to vector<16x32xf32>
    %232 = arith.mulf %205, %231 : vector<16x32xf32>
    %cst_72 = arith.constant dense<0.000000e+00> : vector<16x16xf32>
    %233 = tpu.matmul %229, %204, %cst_72 {dimension_numbers = #tpu.dot_dimension_numbers<[1], [1], [0], [0], [0, 0, 1, 0], [], []>} : vector<16x32xf32>, vector<16x32xf32>, vector<16x16xf32> -> vector<16x16xf32>
    %234 = arith.addf %233, %2 : vector<16x16xf32>
    %cst_73 = arith.constant dense<0xFF800000> : vector<16xf32>
    %235 = vector.multi_reduction <maximumf>, %234, %cst_73 [1] : vector<16x16xf32> to vector<16xf32>
    %236 = vector.shape_cast %235 : vector<16xf32> to vector<16x1xf32>
    %237 = vector.broadcast %236 : vector<16x1xf32> to vector<16x16xf32>
    %238 = arith.subf %234, %237 : vector<16x16xf32>
    %239 = math.exp %238 : vector<16x16xf32>
    %cst_74 = arith.constant dense<0.000000e+00> : vector<16xf32>
    %240 = vector.multi_reduction <add>, %239, %cst_74 [1] : vector<16x16xf32> to vector<16xf32>
    %241 = vector.shape_cast %240 : vector<16xf32> to vector<16x1xf32>
    %242 = tpu.reciprocal %241 : vector<16x1xf32> -> vector<16x1xf32>
    %243 = vector.broadcast %242 : vector<16x1xf32> to vector<16x16xf32>
    %244 = arith.mulf %239, %243 : vector<16x16xf32>
    %cst_75 = arith.constant dense<0.000000e+00> : vector<16x32xf32>
    %245 = tpu.matmul %244, %232, %cst_75 {dimension_numbers = #tpu.dot_dimension_numbers<[1], [0], [0], [1], [0, 0, 1, 1], [], []>} : vector<16x16xf32>, vector<16x32xf32>, vector<16x32xf32> -> vector<16x32xf32>
    %246 = arith.addf %226, %245 : vector<16x32xf32>
    %247 = vector.extract_strided_slice %3 {offsets = [2, 0], sizes = [1, 32], strides = [1, 1]} : vector<4x32xf32> to vector<1x32xf32>
    %248 = vector.broadcast %247 : vector<1x32xf32> to vector<16x32xf32>
    %249 = arith.mulf %203, %248 : vector<16x32xf32>
    %250 = vector.extract_strided_slice %4 {offsets = [2, 0], sizes = [1, 32], strides = [1, 1]} : vector<4x32xf32> to vector<1x32xf32>
    %251 = vector.broadcast %250 : vector<1x32xf32> to vector<16x32xf32>
    %252 = arith.mulf %205, %251 : vector<16x32xf32>
    %cst_76 = arith.constant dense<0.000000e+00> : vector<16x16xf32>
    %253 = tpu.matmul %249, %204, %cst_76 {dimension_numbers = #tpu.dot_dimension_numbers<[1], [1], [0], [0], [0, 0, 1, 0], [], []>} : vector<16x32xf32>, vector<16x32xf32>, vector<16x16xf32> -> vector<16x16xf32>
    %254 = arith.addf %253, %2 : vector<16x16xf32>
    %cst_77 = arith.constant dense<0xFF800000> : vector<16xf32>
    %255 = vector.multi_reduction <maximumf>, %254, %cst_77 [1] : vector<16x16xf32> to vector<16xf32>
    %256 = vector.shape_cast %255 : vector<16xf32> to vector<16x1xf32>
    %257 = vector.broadcast %256 : vector<16x1xf32> to vector<16x16xf32>
    %258 = arith.subf %254, %257 : vector<16x16xf32>
    %259 = math.exp %258 : vector<16x16xf32>
    %cst_78 = arith.constant dense<0.000000e+00> : vector<16xf32>
    %260 = vector.multi_reduction <add>, %259, %cst_78 [1] : vector<16x16xf32> to vector<16xf32>
    %261 = vector.shape_cast %260 : vector<16xf32> to vector<16x1xf32>
    %262 = tpu.reciprocal %261 : vector<16x1xf32> -> vector<16x1xf32>
    %263 = vector.broadcast %262 : vector<16x1xf32> to vector<16x16xf32>
    %264 = arith.mulf %259, %263 : vector<16x16xf32>
    %cst_79 = arith.constant dense<0.000000e+00> : vector<16x32xf32>
    %265 = tpu.matmul %264, %252, %cst_79 {dimension_numbers = #tpu.dot_dimension_numbers<[1], [0], [0], [1], [0, 0, 1, 1], [], []>} : vector<16x16xf32>, vector<16x32xf32>, vector<16x32xf32> -> vector<16x32xf32>
    %266 = arith.addf %246, %265 : vector<16x32xf32>
    %267 = vector.extract_strided_slice %3 {offsets = [3, 0], sizes = [1, 32], strides = [1, 1]} : vector<4x32xf32> to vector<1x32xf32>
    %268 = vector.broadcast %267 : vector<1x32xf32> to vector<16x32xf32>
    %269 = arith.mulf %203, %268 : vector<16x32xf32>
    %270 = vector.extract_strided_slice %4 {offsets = [3, 0], sizes = [1, 32], strides = [1, 1]} : vector<4x32xf32> to vector<1x32xf32>
    %271 = vector.broadcast %270 : vector<1x32xf32> to vector<16x32xf32>
    %272 = arith.mulf %205, %271 : vector<16x32xf32>
    %cst_80 = arith.constant dense<0.000000e+00> : vector<16x16xf32>
    %273 = tpu.matmul %269, %204, %cst_80 {dimension_numbers = #tpu.dot_dimension_numbers<[1], [1], [0], [0], [0, 0, 1, 0], [], []>} : vector<16x32xf32>, vector<16x32xf32>, vector<16x16xf32> -> vector<16x16xf32>
    %274 = arith.addf %273, %2 : vector<16x16xf32>
    %cst_81 = arith.constant dense<0xFF800000> : vector<16xf32>
    %275 = vector.multi_reduction <maximumf>, %274, %cst_81 [1] : vector<16x16xf32> to vector<16xf32>
    %276 = vector.shape_cast %275 : vector<16xf32> to vector<16x1xf32>
    %277 = vector.broadcast %276 : vector<16x1xf32> to vector<16x16xf32>
    %278 = arith.subf %274, %277 : vector<16x16xf32>
    %279 = math.exp %278 : vector<16x16xf32>
    %cst_82 = arith.constant dense<0.000000e+00> : vector<16xf32>
    %280 = vector.multi_reduction <add>, %279, %cst_82 [1] : vector<16x16xf32> to vector<16xf32>
    %281 = vector.shape_cast %280 : vector<16xf32> to vector<16x1xf32>
    %282 = tpu.reciprocal %281 : vector<16x1xf32> -> vector<16x1xf32>
    %283 = vector.broadcast %282 : vector<16x1xf32> to vector<16x16xf32>
    %284 = arith.mulf %279, %283 : vector<16x16xf32>
    %cst_83 = arith.constant dense<0.000000e+00> : vector<16x32xf32>
    %285 = tpu.matmul %284, %272, %cst_83 {dimension_numbers = #tpu.dot_dimension_numbers<[1], [0], [0], [1], [0, 0, 1, 1], [], []>} : vector<16x16xf32>, vector<16x32xf32>, vector<16x32xf32> -> vector<16x32xf32>
    %286 = arith.addf %266, %285 : vector<16x32xf32>
    %cst_84 = arith.constant dense<0.000000e+00> : vector<16x128xf32>
    %287 = tpu.matmul %286, %171, %cst_84 {dimension_numbers = #tpu.dot_dimension_numbers<[1], [0], [0], [1], [0, 0, 1, 1], [], []>} : vector<16x32xf32>, vector<32x128xf32>, vector<16x128xf32> -> vector<16x128xf32>
    %288 = vector.broadcast %172 : vector<1x128xf32> to vector<16x128xf32>
    %289 = arith.addf %287, %288 : vector<16x128xf32>
    %290 = vector.extract_strided_slice %289 {offsets = [0, 0], sizes = [16, 32], strides = [1, 1]} : vector<16x128xf32> to vector<16x32xf32>
    %291 = arith.addf %164, %290 : vector<16x32xf32>
    %cst_85 = arith.constant dense<0.000000e+00> : vector<16xf32>
    %292 = vector.multi_reduction <add>, %291, %cst_85 [1] : vector<16x32xf32> to vector<16xf32>
    %293 = vector.shape_cast %292 : vector<16xf32> to vector<16x1xf32>
    %cst_86 = arith.constant 3.125000e-02 : f32
    %294 = vector.broadcast %cst_86 : f32 to vector<16x1xf32>
    %295 = arith.mulf %293, %294 : vector<16x1xf32>
    %296 = vector.broadcast %295 : vector<16x1xf32> to vector<16x32xf32>
    %297 = arith.subf %291, %296 : vector<16x32xf32>
    %298 = arith.mulf %297, %297 : vector<16x32xf32>
    %cst_87 = arith.constant dense<0.000000e+00> : vector<16xf32>
    %299 = vector.multi_reduction <add>, %298, %cst_87 [1] : vector<16x32xf32> to vector<16xf32>
    %300 = vector.shape_cast %299 : vector<16xf32> to vector<16x1xf32>
    %cst_88 = arith.constant 0.0322580636 : f32
    %301 = vector.broadcast %cst_88 : f32 to vector<16x1xf32>
    %302 = arith.mulf %300, %301 : vector<16x1xf32>
    %303 = math.sqrt %302 : vector<16x1xf32>
    %304 = vector.broadcast %295 : vector<16x1xf32> to vector<16x32xf32>
    %305 = arith.subf %291, %304 : vector<16x32xf32>
    %cst_89 = arith.constant 9.99999997E-7 : f32
    %306 = vector.broadcast %cst_89 : f32 to vector<16x1xf32>
    %307 = arith.addf %303, %306 : vector<16x1xf32>
    %308 = tpu.reciprocal %307 : vector<16x1xf32> -> vector<16x1xf32>
    %309 = vector.broadcast %169 : vector<1x32xf32> to vector<16x32xf32>
    %310 = vector.broadcast %308 : vector<16x1xf32> to vector<16x32xf32>
    %311 = arith.mulf %309, %310 : vector<16x32xf32>
    %312 = arith.mulf %305, %311 : vector<16x32xf32>
    %313 = vector.broadcast %170 : vector<1x32xf32> to vector<16x32xf32>
    %314 = arith.addf %312, %313 : vector<16x32xf32>
    %cst_90 = arith.constant dense<0.000000e+00> : vector<16x128xf32>
    %315 = tpu.matmul %314, %173, %cst_90 {dimension_numbers = #tpu.dot_dimension_numbers<[1], [0], [0], [1], [0, 0, 1, 1], [], []>} : vector<16x32xf32>, vector<32x128xf32>, vector<16x128xf32> -> vector<16x128xf32>
    %316 = vector.broadcast %174 : vector<1x128xf32> to vector<16x128xf32>
    %317 = arith.addf %315, %316 : vector<16x128xf32>
    %cst_91 = arith.constant 0.000000e+00 : f32
    %318 = vector.broadcast %cst_91 : f32 to vector<16x128xf32>
    %319 = arith.maximumf %317, %318 : vector<16x128xf32>
    %cst_92 = arith.constant dense<0.000000e+00> : vector<16x128xf32>
    %320 = tpu.matmul %319, %175, %cst_92 {dimension_numbers = #tpu.dot_dimension_numbers<[1], [0], [0], [1], [0, 0, 1, 1], [], []>} : vector<16x128xf32>, vector<128x128xf32>, vector<16x128xf32> -> vector<16x128xf32>
    %321 = vector.broadcast %176 : vector<1x128xf32> to vector<16x128xf32>
    %322 = arith.addf %320, %321 : vector<16x128xf32>
    %323 = vector.extract_strided_slice %322 {offsets = [0, 0], sizes = [16, 32], strides = [1, 1]} : vector<16x128xf32> to vector<16x32xf32>
    %324 = arith.addf %291, %323 : vector<16x32xf32>
    %c545 = arith.constant 545 : index
    %c0_93 = arith.constant 0 : index
    %325 = vector.load %arg2[%c545, %c0_93] : memref<576x128xf32, #tpu.memory_space<vmem>>, vector<1x32xf32>
    %c546 = arith.constant 546 : index
    %c0_94 = arith.constant 0 : index
    %326 = vector.load %arg2[%c546, %c0_94] : memref<576x128xf32, #tpu.memory_space<vmem>>, vector<1x32xf32>
    %cst_95 = arith.constant dense<0.000000e+00> : vector<16xf32>
    %327 = vector.multi_reduction <add>, %324, %cst_95 [1] : vector<16x32xf32> to vector<16xf32>
    %328 = vector.shape_cast %327 : vector<16xf32> to vector<16x1xf32>
    %cst_96 = arith.constant 3.125000e-02 : f32
    %329 = vector.broadcast %cst_96 : f32 to vector<16x1xf32>
    %330 = arith.mulf %328, %329 : vector<16x1xf32>
    %331 = vector.broadcast %330 : vector<16x1xf32> to vector<16x32xf32>
    %332 = arith.subf %324, %331 : vector<16x32xf32>
    %333 = arith.mulf %332, %332 : vector<16x32xf32>
    %cst_97 = arith.constant dense<0.000000e+00> : vector<16xf32>
    %334 = vector.multi_reduction <add>, %333, %cst_97 [1] : vector<16x32xf32> to vector<16xf32>
    %335 = vector.shape_cast %334 : vector<16xf32> to vector<16x1xf32>
    %cst_98 = arith.constant 0.0322580636 : f32
    %336 = vector.broadcast %cst_98 : f32 to vector<16x1xf32>
    %337 = arith.mulf %335, %336 : vector<16x1xf32>
    %338 = math.sqrt %337 : vector<16x1xf32>
    %339 = vector.broadcast %330 : vector<16x1xf32> to vector<16x32xf32>
    %340 = arith.subf %324, %339 : vector<16x32xf32>
    %cst_99 = arith.constant 9.99999997E-7 : f32
    %341 = vector.broadcast %cst_99 : f32 to vector<16x1xf32>
    %342 = arith.addf %338, %341 : vector<16x1xf32>
    %343 = tpu.reciprocal %342 : vector<16x1xf32> -> vector<16x1xf32>
    %344 = vector.broadcast %325 : vector<1x32xf32> to vector<16x32xf32>
    %345 = vector.broadcast %343 : vector<16x1xf32> to vector<16x32xf32>
    %346 = arith.mulf %344, %345 : vector<16x32xf32>
    %347 = arith.mulf %340, %346 : vector<16x32xf32>
    %348 = vector.broadcast %326 : vector<1x32xf32> to vector<16x32xf32>
    %349 = arith.addf %347, %348 : vector<16x32xf32>
    %c512 = arith.constant 512 : index
    %c0_100 = arith.constant 0 : index
    %350 = vector.load %arg2[%c512, %c0_100] : memref<576x128xf32, #tpu.memory_space<vmem>>, vector<32x128xf32>
    %c544 = arith.constant 544 : index
    %c0_101 = arith.constant 0 : index
    %351 = vector.load %arg2[%c544, %c0_101] : memref<576x128xf32, #tpu.memory_space<vmem>>, vector<1x128xf32>
    %cst_102 = arith.constant dense<0.000000e+00> : vector<16x128xf32>
    %352 = tpu.matmul %349, %350, %cst_102 {dimension_numbers = #tpu.dot_dimension_numbers<[1], [0], [0], [1], [0, 0, 1, 1], [], []>} : vector<16x32xf32>, vector<32x128xf32>, vector<16x128xf32> -> vector<16x128xf32>
    %353 = vector.broadcast %351 : vector<1x128xf32> to vector<16x128xf32>
    %354 = arith.addf %352, %353 : vector<16x128xf32>
    %355 = vector.shape_cast %354 : vector<16x128xf32> to vector<2x8x128xf32>
    %356 = arith.mulf %355, %355 : vector<2x8x128xf32>
    %cst_103 = arith.constant dense<0.000000e+00> : vector<2x128xf32>
    %357 = vector.multi_reduction <add>, %356, %cst_103 [1] : vector<2x8x128xf32> to vector<2x128xf32>
    %358 = vector.shape_cast %357 : vector<2x128xf32> to vector<2x1x128xf32>
    %359 = math.sqrt %358 : vector<2x1x128xf32>
    %cst_104 = arith.constant 9.99999996E-13 : f32
    %360 = vector.broadcast %cst_104 : f32 to vector<2x1x128xf32>
    %361 = arith.maximumf %359, %360 : vector<2x1x128xf32>
    %362 = tpu.reciprocal %361 : vector<2x1x128xf32> -> vector<2x1x128xf32>
    %363 = vector.broadcast %362 : vector<2x1x128xf32> to vector<2x8x128xf32>
    %364 = arith.mulf %355, %363 : vector<2x8x128xf32>
    %c0_105 = arith.constant 0 : index
    %c0_106 = arith.constant 0 : index
    %c0_107 = arith.constant 0 : index
    %365 = vector.load %arg3[%c0_105, %c0_106, %c0_107] : memref<2x8x128xf32, #tpu.memory_space<vmem>>, vector<2x8x128xf32>
    tpu.vector_store %arg3[%c0_105, %c0_106, %c0_107], %364 {strides = array<i32>} : memref<2x8x128xf32, #tpu.memory_space<vmem>>, vector<2x8x128xf32>,
    return
  }
  func.func @transform_0(%arg0: i32) -> (i32, i32, i32) {
    %c0_i32 = arith.constant 0 : i32
    %c0_i32_0 = arith.constant 0 : i32
    %c0_i32_1 = arith.constant 0 : i32
    %c0_i32_2 = arith.constant 0 : i32
    return %c0_i32, %c0_i32_0, %c0_i32_1 : i32, i32, i32
  }
  func.func @transform_1(%arg0: i32) -> (i32, i32) {
    %c0_i32 = arith.constant 0 : i32
    %c0_i32_0 = arith.constant 0 : i32
    %c0_i32_1 = arith.constant 0 : i32
    return %c0_i32, %c0_i32_0 : i32, i32
  }
  func.func @transform_2(%arg0: i32) -> (i32, i32, i32) {
    %c0_i32 = arith.constant 0 : i32
    %c0_i32_0 = arith.constant 0 : i32
    %c0_i32_1 = arith.constant 0 : i32
    %c0_i32_2 = arith.constant 0 : i32
    return %c0_i32, %c0_i32_0, %c0_i32_1 : i32, i32, i32
  }
}

</mosaic_0001>

<bundles_post_ra>
// kernel: tpu_custom_call.1
= control target key start
LH: loop header
LB: loop body
LE: loop exit
PB: predicated region body
PF: predicated region fallthrough
CT: control target
= control target key end

     0   :  { %7 = vsyncpa [#allocation3], 0  ;;  %s2772_s0 = inlined_call_operand.hbm [shape: f32[2,8,32], index: 0, kind: input, shape index: {}]   ;;  %s2773_s1 = inlined_call_operand.hbm [shape: f32[576,128], index: 1, kind: input, shape index: {}]   ;;  %s2774_s2 = inlined_call_operand.hbm [shape: f32[2,8,128], index: 2, kind: output, shape index: {}]  }
   0x1   :  { %8 = vsyncpa [#allocation6], 0 }
   0x2   :  { %9 = vsyncpa [#allocation4], 0  ;;  %s14_s11 = sshll.u32 %s2772_s0, 4  ;;  %s2223_s12 = smov [#allocation2]   ;;  %s15_s11 = int_to_ptr.hbm [resolvable:$true] %s14_s11 }
   0x3   :  { %s16_s13 = sshll.u32 %s2223_s12, 4  ;;  %s27_s16 = sshll.u32 %s2773_s1, 4  ;;  %s17_s13 = int_to_ptr.vmem [resolvable:$true] %s16_s13  ;;  %s28_s16 = int_to_ptr.hbm [resolvable:$true] %s27_s16 }
   0x4   :  { %s2224_s17 = smov 128   ;;  %s2225_s18 = smov 8  }
   0x5   :  { %22 = dma.hbm_to_vmem [thread:$0]  %s15_s11, 256, %s17_s13, [#allocation3], %s2224_s17, %s2224_s17, %s2225_s18  }
   0x6   :  { %s2226_s19 = smov [#allocation5]  }
   0x7   :  { %s29_s20 = sshll.u32 %s2226_s19, 4  ;;  %s30_s20 = int_to_ptr.vmem [resolvable:$true] %s29_s20 }
   0x8   :  { %35 = dma.hbm_to_vmem [thread:$0]  %s28_s16, 9216, %s30_s20, [#allocation6], %s2224_s17, %s2224_s17, %s2225_s18  }
   0x9   :  { %2217 = dma.done.wait [#allocation3], 256  }
   0xa   :  { %2218 = vsyncadd [#allocation3], 4294967040 }
   0xb   :  { %2219 = dma.done.wait [#allocation6], 9216  }
   0xc   :  { %2220 = vsyncadd [#allocation6], 4294958080  ;;  %vm86_vm0 = vcmask 261120   ;;  %v2257_v0 = vld [vmem:[#allocation2 + $0x8] sm:$0xff]  ;;  %v2261_v2 = vld [vmem:[#allocation2] sm:$0xff]  ;;  %s2227_s0 = smov 64  }
   0xd   :  { %v90_v1 = vsel %vm86_vm0, %v2257_v0, 0.0  ;;  %v87_v3 = vsel %vm86_vm0, %v2261_v2, 0.0  ;;  %v53_v14 = vld [vmem:[#allocation5 + $0x18] sm:$0xff]  ;;  %v52_v15 = vld [vmem:[#allocation5 + $0x10] sm:$0xff]  ;;  %v51_v17 = vld [vmem:[#allocation5 + $0x8] sm:$0xff]  ;;  %s2228_s1 = smov 96  }
   0xe   :  { %91 = vadd.xlane.f32.xlu0 %v90_v1  ;;  %1961 = vmatpush.msra.mxu2 %v53_v14  ;;  %v50_v19 = vld [vmem:[#allocation5] sm:$0xff]  ;;  %v2277_v38 = vld [vmem:[#allocation5 + $0x22c] sm:$0xf]  ;;  %vm248_vm13 = vcmask 130048   ;;  %s2229_s21 = smov [#allocation7]   ;;  %s1885_s25 = sshll.u32 %s2774_s2, 4  ;;  %s1886_s25 = int_to_ptr.hbm [resolvable:$true] %s1885_s25 }
   0xf   :  { %188 = vmatpush.msra.mxu0 %v53_v14  ;;  %v202_v40 = vperm.slane %v2277_v38, 0  ;;  %v300_v41 = vperm.slane %v2277_v38, 1  ;;  %v2012_v54 = vld [vmem:[#allocation5 + $0x21] ss:$0 sm:$0xff]  ;;  %v2013_v61 = vld [vmem:[#allocation5 + $0x22] ss:$0 sm:$0xff] }
  0x10   :  { %1962 = vmatpush.msra.mxu2 %v52_v15  ;;  %s1883_s22 = sshll.u32 %s2229_s21, 4  ;;  %s1884_s22 = int_to_ptr.vmem [resolvable:$true] %s1883_s22 }
  0x11   :  { %189 = vmatpush.msra.mxu0 %v52_v15 }
  0x12   :  { %1963 = vmatpush.msra.mxu2 %v51_v17 }
  0x13   :  { %190 = vmatpush.msra.mxu0 %v51_v17 }
  0x14   :  { %1964 = vmatpush.msra.mxu2 %v50_v19 }
  0x15   :  { %191 = vmatpush.msra.mxu0 %v50_v19 }
  0x16   :  { %88 = vadd.xlane.f32.xlu0 %v87_v3 }
  0x2a   :  { %204 = vrot.lane.b32.xlu0 %v202_v40, %s2227_s0  ;;  %v47_v40 = vld [vmem:[#allocation5 + $0x238] sm:$0xff] }
  0x81   :  { %v92_v4 = vpop.xlane.xlu0 %91 }
  0x82   :  { %v94_v5 = vmul.f32 0.03125, %v92_v4 }
  0x84   :  { %v2266_v6 = vsub.f32 %v2257_v0, %v94_v5 }
  0x86   :  { %v98_v7 = vmul.f32 %v2266_v6, %v2266_v6 }
  0x88   :  { %v102_v8 = vsel %vm86_vm0, %v98_v7, 0.0 }
  0x89   :  { %103 = vadd.xlane.f32.xlu1 %v102_v8  ;;  %v89_v9 = vpop.xlane.xlu0 %88 }
  0x8a   :  { %v93_v10 = vmul.f32 0.03125, %v89_v9 }
  0x8c   :  { %v2272_v11 = vsub.f32 %v2261_v2, %v93_v10 }
  0x8e   :  { %v97_v12 = vmul.f32 %v2272_v11, %v2272_v11 }
  0x90   :  { %v99_v13 = vsel %vm86_vm0, %v97_v12, 0.0 }
  0x91   :  { %100 = vadd.xlane.f32.xlu1 %v99_v13 }
  0xaa   :  { %302 = vrot.lane.b32.xlu1 %v300_v41, %s2227_s0 }
  0xfc   :  { %v104_v16 = vpop.xlane.xlu1 %103 }
  0xfd   :  { %v106_v18 = vmul.f32 0.032258064, %v104_v16 }
  0xff   :  { %2031 = vrsqrt.f32 %v106_v18  ;;  %vm126_vm1 = vcmp.eq.f32.partialorder %v106_v18, inf  ;;  %v129_v32 = vand.u32 2147483648, %v106_v18  ;;  %vm128_vm2 = vcmp.eq.f32.partialorder %v106_v18, 0.0 }
 0x104   :  { %v101_v20 = vpop.xlane.xlu1 %100 }
 0x105   :  { %v2032_v21 = vpop.eup %2031  ;;  %v105_v22 = vmul.f32 0.032258064, %v101_v20 }
 0x106   :  { %v120_v23 = vmul.f32 %v2032_v21, %v106_v18 }
 0x107   :  { %2033 = vrsqrt.f32 %v105_v22  ;;  %vm114_vm3 = vcmp.eq.f32.partialorder %v105_v22, inf  ;;  %v117_v43 = vand.u32 2147483648, %v105_v22  ;;  %vm116_vm4 = vcmp.eq.f32.partialorder %v105_v22, 0.0 }
 0x108   :  { %v121_v24 = vmul.f32 %v2032_v21, %v120_v23 }
 0x10a   :  { %v122_v25 = vmul.f32 0.5, %v121_v24 }
 0x10c   :  { %v123_v26 = vsub.f32 1.5, %v122_v25 }
 0x10d   :  { %v2034_v27 = vpop.eup %2033 }
 0x10e   :  { %v124_v28 = vmul.f32 %v2032_v21, %v123_v26  ;;  %v108_v29 = vmul.f32 %v2034_v27, %v105_v22 }
 0x110   :  { %v125_v30 = vmul.f32 %v124_v28, %v106_v18  ;;  %v109_v31 = vmul.f32 %v2034_v27, %v108_v29 }
 0x112   :  { %v127_v33 = vsel %vm126_vm1, %v106_v18, %v125_v30  ;;  %v110_v34 = vmul.f32 0.5, %v109_v31 }
 0x113   :  { %v130_v35 = vsel %vm128_vm2, %v129_v32, %v127_v33  ;;  %v46_v33 = vld [vmem:[#allocation5 + $0x230] sm:$0xff] }
 0x114   :  { %v111_v36 = vsub.f32 1.5, %v110_v34  ;;  %v132_v37 = vadd.f32 1e-06, %v130_v35 }
 0x116   :  { %v112_v39 = vmul.f32 %v2034_v27, %v111_v36  ;;  %2035 = vrcp.f32 %v132_v37  ;;  %v158_v50 = vand.u32 2147483648, %v132_v37  ;;  %v156_v52 = vand.u32 2147483647, %v132_v37 }
 0x117   :  { %vm152_vm6 = vweird.f32 %v132_v37 }
 0x118   :  { %v113_v42 = vmul.f32 %v112_v39, %v105_v22  ;;  %v159_v56 = vor.u32 1.1754944e-38, %v158_v50  ;;  %vm157_vm8 = vcmp.eq.f32.partialorder %v156_v52, 8.507059e+37 }
 0x11a   :  { %v115_v44 = vsel %vm114_vm3, %v105_v22, %v113_v42 }
 0x11b   :  { %v118_v45 = vsel %vm116_vm4, %v117_v43, %v115_v44 }
 0x11c   :  { %v2036_v46 = vpop.eup %2035  ;;  %v131_v47 = vadd.f32 1e-06, %v118_v45 }
 0x11d   :  { %v148_v48 = vmul.f32 %v2036_v46, %v132_v37  ;;  %vm153_vm5 = vweird.f32 %v2036_v46 }
 0x11e   :  { %2037 = vrcp.f32 %v131_v47  ;;  %vm154_vm7 = vmor %vm152_vm6, %vm153_vm5  ;;  %v144_v63 = vand.u32 2147483648, %v131_v47  ;;  %v142_v4 = vand.u32 2147483647, %v131_v47  ;;  %vm138_vm10 = vweird.f32 %v131_v47 }
 0x11f   :  { %v149_v49 = vsub.f32 1.0, %v148_v48 }
 0x120   :  { %v145_v8 = vor.u32 1.1754944e-38, %v144_v63  ;;  %vm143_vm12 = vcmp.eq.f32.partialorder %v142_v4, 8.507059e+37  ;;  %v2355_v63 = vpop.permute.xlu1 %302 }
 0x121   :  { %v150_v51 = vmul.f32 %v2036_v46, %v149_v49 }
 0x123   :  { %v151_v53 = vadd.f32 %v2036_v46, %v150_v51 }
 0x124   :  { %v2038_v55 = vpop.eup %2037 }
 0x125   :  { %v155_v57 = vsel %vm154_vm7, %v2036_v46, %v151_v53  ;;  %v134_v58 = vmul.f32 %v2038_v55, %v131_v47  ;;  %vm139_vm9 = vweird.f32 %v2038_v55 }
 0x126   :  { %v160_v59 = vsel %vm157_vm8, %v159_v56, %v155_v57  ;;  %vm140_vm11 = vmor %vm138_vm10, %vm139_vm9 }
 0x127   :  { %v163_v60 = vmul.f32 %v2012_v54, %v160_v59  ;;  %v135_v62 = vsub.f32 1.0, %v134_v58  ;;  %v587_v58 = vperm.slane %v2277_v38, 3 }
 0x129   :  { %v165_v1 = vmul.f32 %v163_v60, %v2266_v6  ;;  %v136_v3 = vmul.f32 %v2038_v55, %v135_v62  ;;  %v2014_v6 = vld [vmem:[#allocation5 + $0x20] ss:$0 sm:$0xff]  ;;  %v2353_v62 = vpop.permute.xlu0 %204 }
 0x12b   :  { %v168_v5 = vadd.f32 %v2013_v61, %v165_v1  ;;  %v137_v7 = vadd.f32 %v2038_v55, %v136_v3 }
 0x12d   :  { %1900 = vmatmul.msk.f32.vlgmr.msra.gmra.mxu2 %vm86_vm0, %v168_v5  ;;  %v141_v9 = vsel %vm140_vm11, %v2038_v55, %v137_v7  ;;  %v461_v55 = vperm.slane %v2277_v38, 2 }
 0x12e   :  { %v146_v10 = vsel %vm143_vm12, %v145_v8, %v141_v9 }
 0x12f   :  { %v162_v12 = vmul.f32 %v2012_v54, %v146_v10 }
 0x131   :  { %v164_v13 = vmul.f32 %v162_v12, %v2272_v11  ;;  %v48_v11 = vld [vmem:[#allocation5 + $0x228] sm:$0xf] }
 0x132   :  { %v2298_v21 = vperm.slane %v48_v11, 0  ;;  %v2300_v22 = vperm.slane %v48_v11, 1  ;;  %v2304_v23 = vperm.slane %v48_v11, 2  ;;  %v2327_v30 = vperm.slane %v48_v11, 3 }
 0x133   :  { %v167_v14 = vadd.f32 %v2013_v61, %v164_v13 }
 0x135   :  { %1899 = vmatmul.msk.f32.vlgmr.msra.gmra.mxu0 %vm86_vm0, %v167_v14 }
 0x1b0   :  { %v196_v15 = vpop.f32.mrf.mxu2 }
 0x1b1   :  { %v2287_v16 = vadd.f32 %v2014_v6, %v196_v15 }
 0x1b2   :  { %v193_v17 = vpop.f32.mrf.mxu0 }
 0x1b3   :  { %213 = vrot.lane.b32.xlu2 %v2287_v16, %s2228_s1  ;;  %v2291_v18 = vadd.f32 %v2014_v6, %v193_v17  ;;  %v201_v27 = vmul.f32 %v2298_v21, %v2287_v16  ;;  %v299_v28 = vmul.f32 %v2300_v22, %v2287_v16  ;;  %v460_v29 = vmul.f32 %v2304_v23, %v2287_v16 }
 0x1b4   :  { %v586_v32 = vmul.f32 %v2327_v30, %v2287_v16 }
 0x1b5   :  { %v200_v24 = vmul.f32 %v2298_v21, %v2291_v18  ;;  %v298_v25 = vmul.f32 %v2300_v22, %v2291_v18  ;;  %v459_v26 = vmul.f32 %v2304_v23, %v2291_v18  ;;  %v585_v31 = vmul.f32 %v2327_v30, %v2291_v18 }
 0x1bb   :  { %211 = vrot.lane.b32.xlu2 %v2291_v18, %s2228_s1 }
 0x20d   :  { %v214_v19 = vpop.permute.xlu2 %213 }
 0x20e   :  { %1901 = vmatpush.xpose.msk.msra.mxu1 %vm86_vm0, %v214_v19  ;;  %1905 = vmatpush.xpose.msk.msrb.mxu2 %vm86_vm0, %v214_v19 }
 0x20f   :  { %1913 = vmatpush.xpose.msk.msrb.mxu0 %vm86_vm0, %v214_v19 }
 0x215   :  { %v212_v20 = vpop.permute.xlu2 %211 }
 0x216   :  { %1902 = vmatpush.xpose.msk.msra.mxu1 %vm86_vm0, %v212_v20  ;;  %1906 = vmatpush.xpose.msk.msrb.mxu2 %vm86_vm0, %v212_v20 }
 0x217   :  { %1914 = vmatpush.xpose.msk.msrb.mxu0 %vm86_vm0, %v212_v20 }
 0x219   :  { %1903 = vmatmul.msk.f32.vlgmr.msra.gmra.mxu1 %vm86_vm0, %v200_v24  ;;  %1907 = vmatmul.msk.f32.vlgmr.msrb.gmra.mxu2 %vm86_vm0, %v298_v25 }
 0x21a   :  { %1919 = vmatpush.xpose.msk.msra.mxu2 %vm86_vm0, %v214_v19  ;;  %1915 = vmatmul.msk.f32.vlgmr.msrb.gmra.mxu0 %vm86_vm0, %v459_v26 }
 0x21e   :  { %1920 = vmatpush.xpose.msk.msra.mxu2 %vm86_vm0, %v212_v20 }
 0x221   :  { %1904 = vmatmul.msk.f32.gmra.mxu1 %vm86_vm0, %v201_v27  ;;  %1908 = vmatmul.msk.f32.gmra.mxu2 %vm86_vm0, %v299_v28 }
 0x222   :  { %1916 = vmatmul.msk.f32.gmra.mxu0 %vm86_vm0, %v460_v29 }
 0x229   :  { %1921 = vmatmul.msk.f32.vlgmr.msra.gmra.mxu2 %vm86_vm0, %v585_v31 }
 0x231   :  { %1922 = vmatmul.msk.f32.gmra.mxu2 %vm86_vm0, %v586_v32  ;;  %v305_v32 = vmul.f32 %v2355_v63, %v2291_v18 }
 0x296   :  { %v242_v34 = vpop.f32.mrf.mxu1 }
 0x297   :  { %v243_v35 = vadd.f32 %v242_v34, %v46_v33  ;;  %v491_v36 = vpop.f32.mrf.mxu0 }
 0x298   :  { %v492_v41 = vadd.f32 %v491_v36, %v46_v33 }
 0x299   :  { %v249_v37 = vsel %vm248_vm13, %v243_v35, -inf }
 0x29a   :  { %250 = vmax.xlane.f32.xlu0 %v249_v37  ;;  %v497_v48 = vsel %vm248_vm13, %v492_v41, -inf }
 0x29c   :  { %v330_v39 = vpop.f32.mrf.mxu2 }
 0x29d   :  { %v331_v42 = vadd.f32 %v330_v39, %v46_v33 }
 0x29e   :  { %v245_v43 = vpop.f32.mrf.mxu1 }
 0x29f   :  { %v246_v44 = vadd.f32 %v245_v43, %v47_v40  ;;  %v336_v45 = vsel %vm248_vm13, %v331_v42, -inf  ;;  %v494_v46 = vpop.f32.mrf.mxu0 }
 0x2a0   :  { %337 = vmax.xlane.f32.xlu1 %v336_v45  ;;  %v2339_v49 = vadd.f32 %v494_v46, %v47_v40 }
 0x2a1   :  { %v252_v47 = vsel %vm248_vm13, %v246_v44, -inf }
 0x2a2   :  { %253 = vmax.xlane.f32.xlu2 %v252_v47  ;;  %498 = vmax.xlane.f32.xlu0 %v497_v48  ;;  %v500_v51 = vsel %vm248_vm13, %v2339_v49, -inf }
 0x2a4   :  { %v333_v50 = vpop.f32.mrf.mxu2 }
 0x2a5   :  { %v334_v60 = vadd.f32 %v333_v50, %v47_v40 }
 0x2a7   :  { %v339_v61 = vsel %vm248_vm13, %v334_v60, -inf }
 0x2a8   :  { %501 = vmax.xlane.f32.xlu1 %v500_v51 }
 0x2ac   :  { %v617_v52 = vpop.f32.mrf.mxu2 }
 0x2ad   :  { %v2343_v53 = vadd.f32 %v617_v52, %v46_v33  ;;  %v306_v33 = vmul.f32 %v2355_v63, %v2287_v16 }
 0x2af   :  { %v623_v54 = vsel %vm248_vm13, %v2343_v53, -inf  ;;  %v1977_v36 = vpack.i.bf16 %v305_v32, %v306_v33 }
 0x2b0   :  { %624 = vmax.xlane.f32.xlu1 %v623_v54  ;;  %v208_v54 = vmul.f32 %v2353_v62, %v2287_v16 }
 0x2b4   :  { %v620_v56 = vpop.f32.mrf.mxu2 }
 0x2b5   :  { %v621_v57 = vadd.f32 %v620_v56, %v47_v40 }
 0x2b6   :  { %463 = vrot.lane.b32.xlu0 %v461_v55, %s2227_s0 }
 0x2b7   :  { %v626_v59 = vsel %vm248_vm13, %v621_v57, -inf }
 0x2b8   :  { %627 = vmax.xlane.f32.xlu1 %v626_v59 }
 0x2ba   :  { %589 = vrot.lane.b32.xlu2 %v587_v58, %s2227_s0 }
 0x2e0   :  { %340 = vmax.xlane.f32.xlu0 %v339_v61 }
 0x30d   :  { %v251_v1 = vpop.xlane.xlu0 %250 }
 0x30e   :  { %v255_v3 = vsub.f32 %v243_v35, %v251_v1 }
 0x310   :  { %v257_v4 = vmul.f32 1.442695, %v255_v3 }
 0x312   :  { %2039 = vpow2.f32 %v257_v4 }
 0x313   :  { %v338_v5 = vpop.xlane.xlu1 %337 }
 0x314   :  { %v342_v7 = vsub.f32 %v331_v42, %v338_v5 }
 0x315   :  { %v254_v38 = vpop.xlane.xlu2 %253  ;;  %v499_v8 = vpop.xlane.xlu0 %498 }
 0x316   :  { %v344_v9 = vmul.f32 1.442695, %v342_v7  ;;  %v256_v10 = vsub.f32 %v246_v44, %v254_v38  ;;  %v503_v14 = vsub.f32 %v492_v41, %v499_v8 }
 0x318   :  { %v2357_v12 = vpop.eup %2039  ;;  %2041 = vpow2.f32 %v344_v9  ;;  %v259_v13 = vmul.f32 1.442695, %v256_v10  ;;  %v505_v17 = vmul.f32 1.442695, %v503_v14 }
 0x319   :  { %v261_v6 = vsel %vm248_vm13, %v2357_v12, 0.0 }
 0x31a   :  { %2043 = vpow2.f32 %v259_v13  ;;  %262 = vadd.xlane.f32.xlu0 %v261_v6 }
 0x31b   :  { %v502_v15 = vpop.xlane.xlu1 %501  ;;  %2045 = vpow2.f32 %v505_v17 }
 0x31c   :  { %v504_v59 = vsub.f32 %v2339_v49, %v502_v15 }
 0x31d   :  { %v2382_v37 = vpop.permute.xlu2 %589 }
 0x31e   :  { %v2361_v19 = vpop.eup %2041  ;;  %v592_v39 = vmul.f32 %v2382_v37, %v2291_v18  ;;  %v593_v40 = vmul.f32 %v2382_v37, %v2287_v16 }
 0x31f   :  { %v348_v11 = vsel %vm248_vm13, %v2361_v19, 0.0 }
 0x320   :  { %v2365_v20 = vpop.eup %2043  ;;  %349 = vadd.xlane.f32.xlu1 %v348_v11  ;;  %v1982_v42 = vpack.i.bf16 %v592_v39, %v593_v40 }
 0x321   :  { %v264_v24 = vsel %vm248_vm13, %v2365_v20, 0.0  ;;  %v2369_v26 = vpop.eup %2045 }
 0x322   :  { %265 = vadd.xlane.f32.xlu2 %v264_v24  ;;  %v509_v27 = vsel %vm248_vm13, %v2369_v26, 0.0 }
 0x323   :  { %v625_v25 = vpop.xlane.xlu1 %624 }
 0x324   :  { %v629_v43 = vsub.f32 %v2343_v53, %v625_v25  ;;  %v207_v53 = vmul.f32 %v2353_v62, %v2291_v18 }
 0x326   :  { %v631_v46 = vmul.f32 1.442695, %v629_v43  ;;  %v1972_v55 = vpack.i.bf16 %v207_v53, %v208_v54 }
 0x328   :  { %v2388_v41 = vpop.permute.xlu0 %463 }
 0x329   :  { %v466_v56 = vmul.f32 %v2388_v41, %v2291_v18 }
 0x32a   :  { %510 = vadd.xlane.f32.xlu2 %v509_v27 }
 0x32b   :  { %v628_v28 = vpop.xlane.xlu1 %627 }
 0x32c   :  { %v630_v29 = vsub.f32 %v621_v57, %v628_v28  ;;  %v467_v57 = vmul.f32 %v2388_v41, %v2287_v16 }
 0x32e   :  { %v633_v31 = vmul.f32 1.442695, %v630_v29  ;;  %v1987_v58 = vpack.i.bf16 %v466_v56, %v467_v57 }
 0x330   :  { %2047 = vpow2.f32 %v633_v31 }
 0x336   :  { %v2377_v34 = vpop.eup %2047 }
 0x337   :  { %v638_v35 = vsel %vm248_vm13, %v2377_v34, 0.0 }
 0x338   :  { %639 = vadd.xlane.f32.xlu2 %v638_v35 }
 0x339   :  { %1978 = vrot.lane.b32.xlu1 %v1977_v36, %s2227_s0 }
 0x350   :  { %1983 = vrot.lane.b32.xlu2 %v1982_v42, %s2227_s0 }
 0x353   :  { %v341_v44 = vpop.xlane.xlu0 %340 }
 0x354   :  { %v343_v45 = vsub.f32 %v334_v60, %v341_v44  ;;  %v507_v60 = vmul.f32 1.442695, %v504_v59 }
 0x356   :  { %v346_v47 = vmul.f32 1.442695, %v343_v45 }
 0x358   :  { %2049 = vpow2.f32 %v346_v47 }
 0x359   :  { %2051 = vpow2.f32 %v631_v46 }
 0x35a   :  { %2053 = vpow2.f32 %v507_v60 }
 0x35e   :  { %v2392_v48 = vpop.eup %2049 }
 0x35f   :  { %v2394_v50 = vpop.eup %2051  ;;  %v351_v51 = vsel %vm248_vm13, %v2392_v48, 0.0 }
 0x360   :  { %352 = vadd.xlane.f32.xlu0 %v351_v51  ;;  %v635_v52 = vsel %vm248_vm13, %v2394_v50, 0.0  ;;  %v2411_v1 = vpop.eup %2053 }
 0x361   :  { %v512_v18 = vsel %vm248_vm13, %v2411_v1, 0.0 }
 0x363   :  { %636 = vadd.xlane.f32.xlu1 %v635_v52 }
 0x374   :  { %1973 = vrot.lane.b32.xlu0 %v1972_v55, %s2227_s0 }
 0x37c   :  { %1988 = vrot.lane.b32.xlu1 %v1987_v58, %s2227_s0 }
 0x38d   :  { %v263_v11 = vpop.xlane.xlu0 %262 }
 0x38e   :  { %vm272_vm5 = vweird.f32 %v263_v11  ;;  %v278_v54 = vand.u32 2147483648, %v263_v11  ;;  %v276_v58 = vand.u32 2147483647, %v263_v11 }
 0x390   :  { %vm277_vm10 = vcmp.eq.f32.partialorder %v276_v58, 8.507059e+37 }
 0x393   :  { %v350_v61 = vpop.xlane.xlu1 %349 }
 0x394   :  { %2055 = vrcp.f32 %v350_v61  ;;  %v365_v38 = vand.u32 2147483648, %v350_v61  ;;  %vm359_vm15 = vweird.f32 %v350_v61  ;;  %v363_v8 = vand.u32 2147483647, %v350_v61 }
 0x395   :  { %v2417_v17 = vpop.xlane.xlu2 %265  ;;  %2057 = vrcp.f32 %v263_v11 }
 0x396   :  { %v366_v9 = vor.u32 1.1754944e-38, %v365_v38  ;;  %vm364_vm2 = vcmp.eq.f32.partialorder %v363_v8, 8.507059e+37  ;;  %2059 = vrcp.f32 %v2417_v17 }
 0x39a   :  { %v2056_v3 = vpop.eup %2055 }
 0x39b   :  { %v355_v4 = vmul.f32 %v2056_v3, %v350_v61  ;;  %vm360_vm14 = vweird.f32 %v2056_v3  ;;  %v2058_v24 = vpop.eup %2057 }
 0x39c   :  { %vm361_vm1 = vmor %vm359_vm15, %vm360_vm14  ;;  %v268_v27 = vmul.f32 %v2058_v24, %v263_v11  ;;  %v2423_v31 = vpop.eup %2059  ;;  %vm273_vm3 = vweird.f32 %v2058_v24  ;;  %vm286_vm14 = vweird.f32 %v2417_v17 }
 0x39d   :  { %v356_v5 = vsub.f32 1.0, %v355_v4  ;;  %v2419_v25 = vpop.xlane.xlu2 %510  ;;  %v282_v39 = vmul.f32 %v2423_v31, %v2417_v17  ;;  %vm2438_vm7 = vmor %vm272_vm5, %vm273_vm3  ;;  %vm287_vm11 = vweird.f32 %v2423_v31 }
 0x39e   :  { %513 = vadd.xlane.f32.xlu0 %v512_v18  ;;  %2061 = vrcp.f32 %v2419_v25  ;;  %v269_v29 = vsub.f32 1.0, %v268_v27  ;;  %v279_v18 = vor.u32 1.1754944e-38, %v278_v54  ;;  %vm520_vm15 = vweird.f32 %v2419_v25 }
 0x39f   :  { %v357_v7 = vmul.f32 %v2056_v3, %v356_v5  ;;  %v283_v51 = vsub.f32 1.0, %v282_v39  ;;  %v524_v11 = vand.u32 2147483647, %v2419_v25 }
 0x3a0   :  { %v270_v35 = vmul.f32 %v2058_v24, %v269_v29 }
 0x3a1   :  { %v358_v16 = vadd.f32 %v2056_v3, %v357_v7  ;;  %v284_v61 = vmul.f32 %v2423_v31, %v283_v51  ;;  %vm525_vm3 = vcmp.eq.f32.partialorder %v524_v11, 8.507059e+37 }
 0x3a2   :  { %v271_v47 = vadd.f32 %v2058_v24, %v270_v35 }
 0x3a3   :  { %v362_v49 = vsel %vm361_vm1, %v2056_v3, %v358_v16  ;;  %vm2463_vm1 = vmor %vm286_vm14, %vm287_vm11 }
 0x3a4   :  { %v367_v14 = vsel %vm364_vm2, %v366_v9, %v362_v49  ;;  %v2427_v32 = vpop.eup %2061  ;;  %v275_v60 = vsel %vm2438_vm7, %v2058_v24, %v271_v47 }
 0x3a5   :  { %v382_v15 = vmul.f32 %v2361_v19, %v367_v14  ;;  %v516_v40 = vmul.f32 %v2427_v32, %v2419_v25  ;;  %v280_v8 = vsel %vm277_vm10, %v279_v18, %v275_v60  ;;  %vm521_vm12 = vweird.f32 %v2427_v32 }
 0x3a6   :  { %v295_v24 = vmul.f32 %v2357_v12, %v280_v8  ;;  %vm2470_vm2 = vmor %vm520_vm15, %vm521_vm12 }
 0x3a7   :  { %v517_v52 = vsub.f32 1.0, %v516_v40 }
 0x3a9   :  { %v518_v3 = vmul.f32 %v2427_v32, %v517_v52 }
 0x3ab   :  { %v1979_v10 = vpop.permute.xlu1 %1978  ;;  %v2434_v43 = vpop.xlane.xlu2 %639  ;;  %v519_v49 = vadd.f32 %v2427_v32, %v518_v3 }
 0x3ac   :  { %v1980_v13 = vunpack.i.l.bf16 %v1979_v10  ;;  %v1981_v6 = vunpack.i.h.bf16 %v1979_v10  ;;  %vm660_vm10 = vweird.f32 %v2434_v43 }
 0x3ad   :  { %v523_v12 = vsel %vm2470_vm2, %v2427_v32, %v519_v49 }
 0x3ae   :  { %412 = vmatpush.msrb.mxu1 %v1980_v13  ;;  %v285_v13 = vadd.f32 %v2423_v31, %v284_v61 }
 0x3b0   :  { %413 = vmatpush.msrb.mxu1 %v1981_v6  ;;  %v526_v6 = vand.u32 2147483648, %v2419_v25 }
 0x3b1   :  { %1909 = vmatmul.msk.f32.vlgmr.msrb.gmra.mxu1 %vm248_vm13, %v382_v15 }
 0x3b2   :  { %v527_v39 = vor.u32 1.1754944e-38, %v526_v6  ;;  %v59_v6 = vld [vmem:[#allocation5 + $0x28] sm:$0xff] }
 0x3b3   :  { %v1984_v9 = vpop.permute.xlu2 %1983 }
 0x3b4   :  { %v1986_v40 = vunpack.i.h.bf16 %v1984_v9 }
 0x3d3   :  { %v353_v28 = vpop.xlane.xlu0 %352 }
 0x3d4   :  { %2063 = vrcp.f32 %v353_v28  ;;  %v379_v44 = vand.u32 2147483648, %v353_v28  ;;  %v377_v46 = vand.u32 2147483647, %v353_v28  ;;  %vm373_vm6 = vweird.f32 %v353_v28 }
 0x3d6   :  { %v2425_v19 = vpop.xlane.xlu1 %636  ;;  %v380_v57 = vor.u32 1.1754944e-38, %v379_v44  ;;  %vm378_vm9 = vcmp.eq.f32.partialorder %v377_v46, 8.507059e+37  ;;  %v528_v44 = vsel %vm525_vm3, %v527_v39, %v523_v12 }
 0x3d7   :  { %2065 = vrcp.f32 %v2425_v19  ;;  %v652_v51 = vand.u32 2147483648, %v2425_v19 }
 0x3d8   :  { %2067 = vrcp.f32 %v2434_v43 }
 0x3d9   :  { %v653_v58 = vor.u32 1.1754944e-38, %v652_v51 }
 0x3da   :  { %v2064_v33 = vpop.eup %2063 }
 0x3db   :  { %v369_v36 = vmul.f32 %v2064_v33, %v353_v28  ;;  %vm374_vm4 = vweird.f32 %v2064_v33  ;;  %v290_v28 = vand.u32 2147483647, %v2417_v17 }
 0x3dc   :  { %vm375_vm8 = vmor %vm373_vm6, %vm374_vm4  ;;  %vm646_vm6 = vweird.f32 %v2425_v19 }
 0x3dd   :  { %v370_v42 = vsub.f32 1.0, %v369_v36  ;;  %v2436_v53 = vpop.eup %2065  ;;  %vm291_vm4 = vcmp.eq.f32.partialorder %v290_v28, 8.507059e+37 }
 0x3de   :  { %v642_v4 = vmul.f32 %v2436_v53, %v2425_v19  ;;  %v2068_v14 = vpop.eup %2067  ;;  %vm647_vm5 = vweird.f32 %v2436_v53 }
 0x3df   :  { %v371_v45 = vmul.f32 %v2064_v33, %v370_v42  ;;  %v656_v25 = vmul.f32 %v2068_v14, %v2434_v43  ;;  %vm648_vm7 = vmor %vm646_vm6, %vm647_vm5 }
 0x3e0   :  { %v643_v10 = vsub.f32 1.0, %v642_v4 }
 0x3e1   :  { %v372_v55 = vadd.f32 %v2064_v33, %v371_v45  ;;  %v657_v46 = vsub.f32 1.0, %v656_v25 }
 0x3e2   :  { %v644_v35 = vmul.f32 %v2436_v53, %v643_v10 }
 0x3e3   :  { %v376_v59 = vsel %vm375_vm8, %v2064_v33, %v372_v55  ;;  %v1985_v33 = vunpack.i.l.bf16 %v1984_v9  ;;  %v543_v55 = vmul.f32 %v2369_v26, %v528_v44  ;;  %v658_v56 = vmul.f32 %v2068_v14, %v657_v46 }
 0x3e4   :  { %v381_v5 = vsel %vm378_vm9, %v380_v57, %v376_v59  ;;  %v645_v47 = vadd.f32 %v2436_v53, %v644_v35  ;;  %vm661_vm9 = vweird.f32 %v2068_v14  ;;  %v664_v26 = vand.u32 2147483647, %v2434_v43 }
 0x3e5   :  { %v383_v7 = vmul.f32 %v2392_v48, %v381_v5  ;;  %v292_v48 = vand.u32 2147483648, %v2417_v17  ;;  %v289_v17 = vsel %vm2463_vm1, %v2423_v31, %v285_v13  ;;  %v650_v31 = vand.u32 2147483647, %v2425_v19  ;;  %vm662_vm11 = vmor %vm660_vm10, %vm661_vm9  ;;  %v62_v13 = vld [vmem:[#allocation5 + $0x40] sm:$0xff] }
 0x3e6   :  { %v1974_v16 = vpop.permute.xlu0 %1973  ;;  %v649_v57 = vsel %vm648_vm7, %v2436_v53, %v645_v47  ;;  %v659_v60 = vadd.f32 %v2068_v14, %v658_v56  ;;  %v666_v19 = vand.u32 2147483648, %v2434_v43  ;;  %vm665_vm12 = vcmp.eq.f32.partialorder %v664_v26, 8.507059e+37  ;;  %729 = vmatpush.msra.mxu0 %v62_v13 }
 0x3e7   :  { %1910 = vmatmul.msk.f32.gmra.mxu1 %vm248_vm13, %v383_v7  ;;  %v1975_v38 = vunpack.i.l.bf16 %v1974_v16  ;;  %v1976_v15 = vunpack.i.h.bf16 %v1974_v16  ;;  %v293_v36 = vor.u32 1.1754944e-38, %v292_v48  ;;  %vm651_vm8 = vcmp.eq.f32.partialorder %v650_v31, 8.507059e+37  ;;  %v60_v48 = vld [vmem:[#allocation5 + $0x30] sm:$0xff] }
 0x3e8   :  { %v654_v59 = vsel %vm651_vm8, %v653_v58, %v649_v57  ;;  %v663_v61 = vsel %vm662_vm11, %v2068_v14, %v659_v60  ;;  %v667_v3 = vor.u32 1.1754944e-38, %v666_v19  ;;  %v61_v14 = vld [vmem:[#allocation5 + $0x38] sm:$0xff] }
 0x3e9   :  { %449 = vmatpush.msra.mxu3 %v1975_v38  ;;  %v294_v32 = vsel %vm291_vm4, %v293_v36, %v289_v17  ;;  %730 = vmatpush.msra.mxu0 %v61_v14 }
 0x3ea   :  { %v296_v54 = vmul.f32 %v2365_v20, %v294_v32  ;;  %v669_v20 = vmul.f32 %v2394_v50, %v654_v59  ;;  %v668_v53 = vsel %vm665_vm12, %v667_v3, %v663_v61  ;;  %v67_v3 = vld [vmem:[#allocation5 + $0x68] sm:$0xff] }
 0x3eb   :  { %450 = vmatpush.msra.mxu3 %v1976_v15  ;;  %v670_v4 = vmul.f32 %v2377_v34, %v668_v53  ;;  %731 = vmatpush.msra.mxu0 %v60_v48 }
 0x3ec   :  { %1911 = vmatmul.msk.f32.vlgmr.msra.gmra.mxu3 %vm248_vm13, %v295_v24 }
 0x3ed   :  { %699 = vmatpush.msrb.mxu3 %v1985_v33  ;;  %732 = vmatpush.msra.mxu0 %v59_v6 }
 0x3ee   :  { %v1989_v42 = vpop.permute.xlu1 %1988 }
 0x3ef   :  { %v1990_v45 = vunpack.i.l.bf16 %v1989_v42  ;;  %700 = vmatpush.msrb.mxu3 %v1986_v40  ;;  %v1991_v52 = vunpack.i.h.bf16 %v1989_v42  ;;  %v2015_v40 = vld [vmem:[#allocation5 + $0x48] ss:$0 sm:$0xff] }
 0x3f1   :  { %573 = vmatpush.msra.mxu1 %v1990_v45 }
 0x3f3   :  { %574 = vmatpush.msra.mxu1 %v1991_v52 }
 0x3f4   :  { %1912 = vmatmul.msk.f32.gmra.mxu3 %vm248_vm13, %v296_v54  ;;  %1917 = vmatmul.msk.f32.vlgmr.msra.gmra.mxu1 %vm248_vm13, %v543_v55 }
 0x3f5   :  { %843 = vmatpush.msrb.mxu1 %v67_v3 }
 0x3fc   :  { %1923 = vmatmul.msk.f32.vlgmr.msrb.gmra.mxu3 %vm248_vm13, %v669_v20 }
 0x404   :  { %1924 = vmatmul.msk.f32.gmra.mxu3 %vm248_vm13, %v670_v4  ;;  %v66_v4 = vld [vmem:[#allocation5 + $0x60] sm:$0xff] }
 0x405   :  { %844 = vmatpush.msrb.mxu1 %v66_v4 }
 0x411   :  { %v514_v5 = vpop.xlane.xlu0 %513 }
 0x412   :  { %2069 = vrcp.f32 %v514_v5  ;;  %v540_v38 = vand.u32 2147483648, %v514_v5  ;;  %v538_v43 = vand.u32 2147483647, %v514_v5  ;;  %vm534_vm15 = vweird.f32 %v514_v5 }
 0x414   :  { %v541_v49 = vor.u32 1.1754944e-38, %v540_v38  ;;  %vm539_vm2 = vcmp.eq.f32.partialorder %v538_v43, 8.507059e+37 }
 0x418   :  { %v2070_v18 = vpop.eup %2069 }
 0x419   :  { %v530_v7 = vmul.f32 %v2070_v18, %v514_v5  ;;  %vm535_vm14 = vweird.f32 %v2070_v18 }
 0x41a   :  { %vm536_vm1 = vmor %vm534_vm15, %vm535_vm14 }
 0x41b   :  { %v531_v16 = vsub.f32 1.0, %v530_v7 }
 0x41d   :  { %v532_v50 = vmul.f32 %v2070_v18, %v531_v16  ;;  %v64_v16 = vld [vmem:[#allocation5 + $0x50] sm:$0xff] }
 0x41f   :  { %v533_v8 = vadd.f32 %v2070_v18, %v532_v50 }
 0x421   :  { %v537_v9 = vsel %vm536_vm1, %v2070_v18, %v533_v8  ;;  %v65_v18 = vld [vmem:[#allocation5 + $0x58] sm:$0xff] }
 0x422   :  { %v542_v10 = vsel %vm539_vm2, %v541_v49, %v537_v9  ;;  %845 = vmatpush.msrb.mxu1 %v65_v18 }
 0x423   :  { %v544_v34 = vmul.f32 %v2411_v1, %v542_v10 }
 0x424   :  { %846 = vmatpush.msrb.mxu1 %v64_v16 }
 0x425   :  { %1918 = vmatmul.msk.f32.gmra.mxu1 %vm248_vm13, %v544_v34 }
 0x42e   :  { %v415_v15 = vpop.f32.mrf.mxu1 }
 0x464   :  { %v418_v24 = vpop.f32.mrf.mxu1 }
 0x46f   :  { %v452_v11 = vpop.f32.mrf.mxu3 }
 0x470   :  { %v453_v28 = vadd.f32 %v452_v11, %v415_v15 }
 0x471   :  { %v576_v29 = vpop.f32.mrf.mxu1 }
 0x472   :  { %v582_v33 = vadd.f32 %v576_v29, %v453_v28 }
 0x477   :  { %v455_v27 = vpop.f32.mrf.mxu3 }
 0x478   :  { %v456_v1 = vadd.f32 %v455_v27, %v418_v24  ;;  %v2522_v27 = vld [vmem:[#allocation5 + $0x23] ss:$0 sm:$0xff] }
 0x47f   :  { %v702_v12 = vpop.f32.mrf.mxu3 }
 0x480   :  { %v708_v25 = vadd.f32 %v702_v12, %v582_v33 }
 0x482   :  { %1925 = vmatmul.msk.f32.vlgmr.msra.gmra.mxu0 %vm86_vm0, %v708_v25  ;;  %v2017_v25 = vld [vmem:[#allocation5 + $0x24] ss:$0 sm:$0xff] }
 0x487   :  { %v705_v36 = vpop.f32.mrf.mxu3 }
 0x4a2   :  { %v579_v35 = vpop.f32.mrf.mxu1 }
 0x4a3   :  { %v583_v17 = vadd.f32 %v579_v35, %v456_v1 }
 0x4a5   :  { %v709_v39 = vadd.f32 %v705_v36, %v583_v17 }
 0x4a7   :  { %1926 = vmatmul.msk.f32.gmra.mxu0 %vm86_vm0, %v709_v39 }
 0x4ff   :  { %v734_v42 = vpop.f32.mrf.mxu0 }
 0x500   :  { %v735_v44 = vadd.f32 %v2015_v40, %v734_v42 }
 0x502   :  { %v2505_v45 = vadd.f32 %v735_v44, %v2261_v2  ;;  %v84_v44 = vld [vmem:[#allocation5 + $0xf0] sm:$0xff] }
 0x503   :  { %857 = vmatpush.msrb.mxu2 %v84_v44 }
 0x504   :  { %v742_v32 = vsel %vm86_vm0, %v2505_v45, 0.0 }
 0x505   :  { %743 = vadd.xlane.f32.xlu1 %v742_v32  ;;  %v83_v32 = vld [vmem:[#allocation5 + $0xe8] sm:$0xff] }
 0x506   :  { %858 = vmatpush.msrb.mxu2 %v83_v32 }
 0x524   :  { %v737_v46 = vpop.f32.mrf.mxu0 }
 0x525   :  { %v738_v47 = vadd.f32 %v2015_v40, %v737_v46 }
 0x527   :  { %v2510_v51 = vadd.f32 %v738_v47, %v2257_v0  ;;  %v82_v47 = vld [vmem:[#allocation5 + $0xe0] sm:$0xff] }
 0x528   :  { %859 = vmatpush.msrb.mxu2 %v82_v47 }
 0x529   :  { %v745_v52 = vsel %vm86_vm0, %v2510_v51, 0.0 }
 0x52a   :  { %746 = vadd.xlane.f32.xlu2 %v745_v52 }
 0x578   :  { %v744_v31 = vpop.xlane.xlu1 %743 }
 0x579   :  { %v748_v54 = vmul.f32 0.03125, %v744_v31 }
 0x57b   :  { %v750_v55 = vsub.f32 %v2505_v45, %v748_v54  ;;  %v81_v54 = vld [vmem:[#allocation5 + $0xd8] sm:$0xff] }
 0x57c   :  { %860 = vmatpush.msrb.mxu2 %v81_v54 }
 0x57d   :  { %v752_v56 = vmul.f32 %v750_v55, %v750_v55 }
 0x57f   :  { %v754_v2 = vsel %vm86_vm0, %v752_v56, 0.0 }
 0x580   :  { %755 = vadd.xlane.f32.xlu0 %v754_v2  ;;  %v80_v2 = vld [vmem:[#allocation5 + $0xd0] sm:$0xff] }
 0x581   :  { %861 = vmatpush.msrb.mxu2 %v80_v2  ;;  %v885_v2 = vld [vmem:[#allocation5 + $0x118] sm:$0xff] }
 0x582   :  { %1019 = vmatpush.msra.mxu3 %v885_v2 }
 0x59d   :  { %v747_v57 = vpop.xlane.xlu2 %746 }
 0x59e   :  { %v749_v58 = vmul.f32 0.03125, %v747_v57 }
 0x5a0   :  { %v2517_v59 = vsub.f32 %v2510_v51, %v749_v58  ;;  %v79_v58 = vld [vmem:[#allocation5 + $0xc8] sm:$0xff] }
 0x5a1   :  { %862 = vmatpush.msrb.mxu2 %v79_v58  ;;  %v884_v58 = vld [vmem:[#allocation5 + $0x110] sm:$0xff] }
 0x5a2   :  { %v753_v0 = vmul.f32 %v2517_v59, %v2517_v59  ;;  %1020 = vmatpush.msra.mxu3 %v884_v58 }
 0x5a4   :  { %v757_v60 = vsel %vm86_vm0, %v753_v0, 0.0  ;;  %v78_v0 = vld [vmem:[#allocation5 + $0xc0] sm:$0xff] }
 0x5a5   :  { %758 = vadd.xlane.f32.xlu0 %v757_v60  ;;  %v77_v60 = vld [vmem:[#allocation5 + $0xb8] sm:$0xff]  ;;  %863 = vmatpush.msrb.mxu2 %v78_v0 }
 0x5a7   :  { %864 = vmatpush.msrb.mxu2 %v77_v60  ;;  %v883_v60 = vld [vmem:[#allocation5 + $0x108] sm:$0xff] }
 0x5a8   :  { %1021 = vmatpush.msra.mxu3 %v883_v60 }
 0x5f3   :  { %v756_v19 = vpop.xlane.xlu0 %755 }
 0x5f4   :  { %v760_v20 = vmul.f32 0.032258064, %v756_v19  ;;  %v76_v19 = vld [vmem:[#allocation5 + $0xb0] sm:$0xff] }
 0x5f5   :  { %865 = vmatpush.msrb.mxu2 %v76_v19 }
 0x5f6   :  { %2071 = vrsqrt.f32 %v760_v20  ;;  %vm769_vm3 = vcmp.eq.f32.partialorder %v760_v20, inf  ;;  %v772_v43 = vand.u32 2147483648, %v760_v20  ;;  %vm771_vm4 = vcmp.eq.f32.partialorder %v760_v20, 0.0 }
 0x5fc   :  { %v2072_v26 = vpop.eup %2071 }
 0x5fd   :  { %v763_v61 = vmul.f32 %v2072_v26, %v760_v20 }
 0x5ff   :  { %v764_v53 = vmul.f32 %v2072_v26, %v763_v61  ;;  %v75_v61 = vld [vmem:[#allocation5 + $0xa8] sm:$0xff] }
 0x600   :  { %866 = vmatpush.msrb.mxu2 %v75_v61 }
 0x601   :  { %v765_v5 = vmul.f32 0.5, %v764_v53  ;;  %v74_v53 = vld [vmem:[#allocation5 + $0xa0] sm:$0xff] }
 0x602   :  { %867 = vmatpush.msrb.mxu2 %v74_v53 }
 0x603   :  { %v766_v7 = vsub.f32 1.5, %v765_v5 }
 0x605   :  { %v767_v38 = vmul.f32 %v2072_v26, %v766_v7  ;;  %v73_v7 = vld [vmem:[#allocation5 + $0x98] sm:$0xff] }
 0x606   :  { %868 = vmatpush.msrb.mxu2 %v73_v7 }
 0x607   :  { %v768_v50 = vmul.f32 %v767_v38, %v760_v20  ;;  %v72_v38 = vld [vmem:[#allocation5 + $0x90] sm:$0xff] }
 0x608   :  { %869 = vmatpush.msrb.mxu2 %v72_v38 }
 0x609   :  { %v770_v8 = vsel %vm769_vm3, %v760_v20, %v768_v50 }
 0x60a   :  { %v773_v49 = vsel %vm771_vm4, %v772_v43, %v770_v8 }
 0x60b   :  { %v786_v9 = vadd.f32 1e-06, %v773_v49 }
 0x60d   :  { %2073 = vrcp.f32 %v786_v9  ;;  %v799_v14 = vand.u32 2147483648, %v786_v9  ;;  %v797_v15 = vand.u32 2147483647, %v786_v9  ;;  %vm793_vm6 = vweird.f32 %v786_v9 }
 0x60f   :  { %v800_v28 = vor.u32 1.1754944e-38, %v799_v14  ;;  %vm798_vm8 = vcmp.eq.f32.partialorder %v797_v15, 8.507059e+37  ;;  %v69_v14 = vld [vmem:[#allocation5 + $0x78] sm:$0xff] }
 0x613   :  { %v2074_v10 = vpop.eup %2073 }
 0x614   :  { %v789_v34 = vmul.f32 %v2074_v10, %v786_v9  ;;  %vm794_vm5 = vweird.f32 %v2074_v10 }
 0x615   :  { %vm795_vm7 = vmor %vm793_vm6, %vm794_vm5 }
 0x616   :  { %v790_v13 = vsub.f32 1.0, %v789_v34  ;;  %v71_v34 = vld [vmem:[#allocation5 + $0x88] sm:$0xff] }
 0x617   :  { %870 = vmatpush.msrb.mxu2 %v71_v34 }
 0x618   :  { %v759_v48 = vpop.xlane.xlu0 %758  ;;  %v791_v6 = vmul.f32 %v2074_v10, %v790_v13  ;;  %v70_v13 = vld [vmem:[#allocation5 + $0x80] sm:$0xff] }
 0x619   :  { %v761_v11 = vmul.f32 0.032258064, %v759_v48  ;;  %871 = vmatpush.msrb.mxu2 %v70_v13  ;;  %v2018_v48 = vld [vmem:[#allocation5 + $0x70] ss:$0 sm:$0xff] }
 0x61a   :  { %v792_v24 = vadd.f32 %v2074_v10, %v791_v6 }
 0x61b   :  { %2075 = vrsqrt.f32 %v761_v11  ;;  %vm781_vm9 = vcmp.eq.f32.partialorder %v761_v11, inf  ;;  %v784_v31 = vand.u32 2147483648, %v761_v11  ;;  %vm783_vm10 = vcmp.eq.f32.partialorder %v761_v11, 0.0  ;;  %872 = vmatpush.msrb.mxu2 %v69_v14 }
 0x61c   :  { %v796_v29 = vsel %vm795_vm7, %v2074_v10, %v792_v24 }
 0x61d   :  { %v801_v33 = vsel %vm798_vm8, %v800_v28, %v796_v29 }
 0x61e   :  { %v817_v12 = vmul.f32 %v2522_v27, %v801_v33 }
 0x620   :  { %v819_v1 = vmul.f32 %v817_v12, %v750_v55 }
 0x621   :  { %v2076_v35 = vpop.eup %2075 }
 0x622   :  { %v775_v17 = vmul.f32 %v2076_v35, %v761_v11  ;;  %v822_v36 = vadd.f32 %v2017_v25, %v819_v1 }
 0x624   :  { %v776_v39 = vmul.f32 %v2076_v35, %v775_v17  ;;  %1927 = vmatmul.msk.f32.vlgmr.msrb.gmra.mxu1 %vm86_vm0, %v822_v36 }
 0x626   :  { %v777_v40 = vmul.f32 0.5, %v776_v39 }
 0x628   :  { %v778_v42 = vsub.f32 1.5, %v777_v40 }
 0x62a   :  { %v779_v46 = vmul.f32 %v2076_v35, %v778_v42 }
 0x62c   :  { %v780_v52 = vmul.f32 %v779_v46, %v761_v11 }
 0x62e   :  { %v782_v56 = vsel %vm781_vm9, %v761_v11, %v780_v52 }
 0x62f   :  { %v785_v55 = vsel %vm783_vm10, %v784_v31, %v782_v56 }
 0x630   :  { %v787_v57 = vadd.f32 1e-06, %v785_v55 }
 0x632   :  { %2077 = vrcp.f32 %v787_v57  ;;  %v813_v4 = vand.u32 2147483648, %v787_v57  ;;  %v811_v18 = vand.u32 2147483647, %v787_v57  ;;  %vm807_vm12 = vweird.f32 %v787_v57 }
 0x634   :  { %v814_v50 = vor.u32 1.1754944e-38, %v813_v4  ;;  %vm812_vm15 = vcmp.eq.f32.partialorder %v811_v18, 8.507059e+37 }
 0x638   :  { %v2078_v20 = vpop.eup %2077 }
 0x639   :  { %v803_v26 = vmul.f32 %v2078_v20, %v787_v57  ;;  %vm808_vm11 = vweird.f32 %v2078_v20 }
 0x63a   :  { %vm809_vm14 = vmor %vm807_vm12, %vm808_vm11 }
 0x63b   :  { %v804_v3 = vsub.f32 1.0, %v803_v26 }
 0x63d   :  { %v805_v5 = vmul.f32 %v2078_v20, %v804_v3 }
 0x63f   :  { %v806_v16 = vadd.f32 %v2078_v20, %v805_v5 }
 0x641   :  { %v810_v43 = vsel %vm809_vm14, %v2078_v20, %v806_v16  ;;  %v882_v20 = vld [vmem:[#allocation5 + $0x100] sm:$0xff] }
 0x642   :  { %v815_v8 = vsel %vm812_vm15, %v814_v50, %v810_v43  ;;  %1022 = vmatpush.msra.mxu3 %v882_v20 }
 0x643   :  { %v818_v49 = vmul.f32 %v2522_v27, %v815_v8  ;;  %v2019_v27 = vld [vmem:[#allocation5 + $0xf8] ss:$0 sm:$0xff] }
 0x645   :  { %v820_v9 = vmul.f32 %v818_v49, %v2517_v59 }
 0x647   :  { %v823_v10 = vadd.f32 %v2017_v25, %v820_v9 }
 0x649   :  { %1928 = vmatmul.msk.f32.gmra.mxu1 %vm86_vm0, %v823_v10  ;;  %v2020_v10 = vld [vmem:[#allocation5 + $0x121] ss:$0 sm:$0xff] }
 0x6a1   :  { %v848_v6 = vpop.f32.mrf.mxu1 }
 0x6a2   :  { %v849_v15 = vadd.f32 %v2018_v48, %v848_v6  ;;  %v2021_v6 = vld [vmem:[#allocation5 + $0x122] ss:$0 sm:$0xff] }
 0x6a4   :  { %v854_v11 = vmax.f32 %v849_v15, 0.0 }
 0x6a6   :  { %873 = vmatmul.f32.vlgmr.msrb.gmra.mxu2 %v854_v11 }
 0x6c6   :  { %v851_v24 = vpop.f32.mrf.mxu1 }
 0x6c7   :  { %v852_v28 = vadd.f32 %v2018_v48, %v851_v24 }
 0x6c9   :  { %v855_v29 = vmax.f32 %v852_v28, 0.0 }
 0x6cb   :  { %876 = vmatmul.f32.gmra.mxu2 %v855_v29 }
 0x729   :  { %v874_v59 = vpop.f32.mrf.mxu2 }
 0x72a   :  { %v875_v33 = vadd.f32 %v2019_v27, %v874_v59 }
 0x72c   :  { %v2530_v12 = vadd.f32 %v875_v33, %v2505_v45 }
 0x72e   :  { %v918_v25 = vsel %vm86_vm0, %v2530_v12, 0.0 }
 0x72f   :  { %919 = vadd.xlane.f32.xlu0 %v918_v25 }
 0x74e   :  { %v877_v1 = vpop.f32.mrf.mxu2 }
 0x74f   :  { %v878_v35 = vadd.f32 %v2019_v27, %v877_v1 }
 0x751   :  { %v2535_v17 = vadd.f32 %v878_v35, %v2510_v51 }
 0x753   :  { %v921_v36 = vsel %vm86_vm0, %v2535_v17, 0.0 }
 0x754   :  { %922 = vadd.xlane.f32.xlu1 %v921_v36 }
 0x7a2   :  { %v920_v39 = vpop.xlane.xlu0 %919 }
 0x7a3   :  { %v924_v40 = vmul.f32 0.03125, %v920_v39 }
 0x7a5   :  { %v926_v42 = vsub.f32 %v2530_v12, %v924_v40 }
 0x7a7   :  { %v928_v44 = vmul.f32 %v926_v42, %v926_v42 }
 0x7a9   :  { %v930_v45 = vsel %vm86_vm0, %v928_v44, 0.0 }
 0x7aa   :  { %931 = vadd.xlane.f32.xlu2 %v930_v45 }
 0x7c7   :  { %v923_v32 = vpop.xlane.xlu1 %922 }
 0x7c8   :  { %v925_v46 = vmul.f32 0.03125, %v923_v32 }
 0x7ca   :  { %v2542_v47 = vsub.f32 %v2535_v17, %v925_v46 }
 0x7cc   :  { %v929_v51 = vmul.f32 %v2542_v47, %v2542_v47 }
 0x7ce   :  { %v933_v52 = vsel %vm86_vm0, %v929_v51, 0.0 }
 0x7cf   :  { %934 = vadd.xlane.f32.xlu0 %v933_v52 }
 0x81d   :  { %v932_v31 = vpop.xlane.xlu2 %931 }
 0x81e   :  { %v936_v54 = vmul.f32 0.032258064, %v932_v31 }
 0x820   :  { %2079 = vrsqrt.f32 %v936_v54  ;;  %vm945_vm1 = vcmp.eq.f32.partialorder %v936_v54, inf  ;;  %v948_v3 = vand.u32 2147483648, %v936_v54  ;;  %vm947_vm2 = vcmp.eq.f32.partialorder %v936_v54, 0.0 }
 0x826   :  { %v2080_v56 = vpop.eup %2079 }
 0x827   :  { %v939_v55 = vmul.f32 %v2080_v56, %v936_v54 }
 0x829   :  { %v940_v57 = vmul.f32 %v2080_v56, %v939_v55 }
 0x82b   :  { %v941_v0 = vmul.f32 0.5, %v940_v57  ;;  %v2022_v57 = vld [vmem:[#allocation5 + $0x120] ss:$0 sm:$0xff] }
 0x82d   :  { %v942_v19 = vsub.f32 1.5, %v941_v0 }
 0x82f   :  { %v943_v26 = vmul.f32 %v2080_v56, %v942_v19 }
 0x831   :  { %v944_v61 = vmul.f32 %v943_v26, %v936_v54 }
 0x833   :  { %v946_v53 = vsel %vm945_vm1, %v936_v54, %v944_v61 }
 0x834   :  { %v949_v4 = vsel %vm947_vm2, %v948_v3, %v946_v53 }
 0x835   :  { %v962_v5 = vadd.f32 1e-06, %v949_v4 }
 0x837   :  { %2081 = vrcp.f32 %v962_v5  ;;  %v975_v38 = vand.u32 2147483648, %v962_v5  ;;  %v973_v8 = vand.u32 2147483647, %v962_v5  ;;  %vm969_vm4 = vweird.f32 %v962_v5 }
 0x839   :  { %v976_v34 = vor.u32 1.1754944e-38, %v975_v38  ;;  %vm974_vm6 = vcmp.eq.f32.partialorder %v973_v8, 8.507059e+37 }
 0x83d   :  { %v2082_v18 = vpop.eup %2081 }
 0x83e   :  { %v965_v7 = vmul.f32 %v2082_v18, %v962_v5  ;;  %vm970_vm3 = vweird.f32 %v2082_v18 }
 0x83f   :  { %vm971_vm5 = vmor %vm969_vm4, %vm970_vm3 }
 0x840   :  { %v966_v16 = vsub.f32 1.0, %v965_v7 }
 0x842   :  { %v935_v50 = vpop.xlane.xlu0 %934  ;;  %v967_v43 = vmul.f32 %v2082_v18, %v966_v16 }
 0x843   :  { %v937_v49 = vmul.f32 0.032258064, %v935_v50 }
 0x844   :  { %v968_v9 = vadd.f32 %v2082_v18, %v967_v43 }
 0x845   :  { %2083 = vrsqrt.f32 %v937_v49  ;;  %vm957_vm7 = vcmp.eq.f32.partialorder %v937_v49, inf  ;;  %v960_v1 = vand.u32 2147483648, %v937_v49  ;;  %vm959_vm8 = vcmp.eq.f32.partialorder %v937_v49, 0.0 }
 0x846   :  { %v972_v13 = vsel %vm971_vm5, %v2082_v18, %v968_v9 }
 0x847   :  { %v977_v14 = vsel %vm974_vm6, %v976_v34, %v972_v13 }
 0x848   :  { %v993_v48 = vmul.f32 %v2020_v10, %v977_v14 }
 0x84a   :  { %v995_v15 = vmul.f32 %v993_v48, %v926_v42 }
 0x84b   :  { %v2084_v11 = vpop.eup %2083 }
 0x84c   :  { %v951_v24 = vmul.f32 %v2084_v11, %v937_v49  ;;  %v998_v28 = vadd.f32 %v2021_v6, %v995_v15 }
 0x84e   :  { %v952_v29 = vmul.f32 %v2084_v11, %v951_v24  ;;  %1929 = vmatmul.msk.f32.vlgmr.msra.gmra.mxu3 %vm86_vm0, %v998_v28 }
 0x850   :  { %v953_v27 = vmul.f32 0.5, %v952_v29 }
 0x852   :  { %v954_v59 = vsub.f32 1.5, %v953_v27 }
 0x854   :  { %v955_v33 = vmul.f32 %v2084_v11, %v954_v59  ;;  %v2623_v11 = vld [vmem:[#allocation5 + $0x238] sm:$0xff] }
 0x856   :  { %v956_v25 = vmul.f32 %v955_v33, %v937_v49 }
 0x858   :  { %v958_v35 = vsel %vm957_vm7, %v937_v49, %v956_v25 }
 0x859   :  { %v961_v36 = vsel %vm959_vm8, %v960_v1, %v958_v35 }
 0x85a   :  { %v963_v39 = vadd.f32 1e-06, %v961_v36 }
 0x85c   :  { %2085 = vrcp.f32 %v963_v39  ;;  %v989_v45 = vand.u32 2147483648, %v963_v39  ;;  %v987_v46 = vand.u32 2147483647, %v963_v39  ;;  %vm983_vm10 = vweird.f32 %v963_v39 }
 0x85e   :  { %v990_v52 = vor.u32 1.1754944e-38, %v989_v45  ;;  %vm988_vm12 = vcmp.eq.f32.partialorder %v987_v46, 8.507059e+37 }
 0x862   :  { %v2086_v40 = vpop.eup %2085 }
 0x863   :  { %v979_v44 = vmul.f32 %v2086_v40, %v963_v39  ;;  %vm984_vm9 = vweird.f32 %v2086_v40 }
 0x864   :  { %vm985_vm11 = vmor %vm983_vm10, %vm984_vm9 }
 0x865   :  { %v980_v42 = vsub.f32 1.0, %v979_v44 }
 0x867   :  { %v981_v32 = vmul.f32 %v2086_v40, %v980_v42 }
 0x869   :  { %v982_v51 = vadd.f32 %v2086_v40, %v981_v32 }
 0x86b   :  { %v986_v31 = vsel %vm985_vm11, %v2086_v40, %v982_v51 }
 0x86c   :  { %v991_v54 = vsel %vm988_vm12, %v990_v52, %v986_v31 }
 0x86d   :  { %v994_v56 = vmul.f32 %v2020_v10, %v991_v54 }
 0x86f   :  { %v996_v55 = vmul.f32 %v994_v56, %v2542_v47 }
 0x871   :  { %v999_v2 = vadd.f32 %v2021_v6, %v996_v55 }
 0x873   :  { %1930 = vmatmul.msk.f32.gmra.mxu3 %vm86_vm0, %v999_v2 }
 0x8d1   :  { %v1024_v58 = vpop.f32.mrf.mxu3 }
 0x8d2   :  { %v2550_v0 = vadd.f32 %v2022_v57, %v1024_v58 }
 0x8d4   :  { %1036 = vrot.lane.b32.xlu2 %v2550_v0, %s2228_s1  ;;  %v1123_v20 = vmul.f32 %v2550_v0, %v2355_v63  ;;  %v2564_v26 = vmul.f32 %v2550_v0, %v2353_v62  ;;  %v2568_v61 = vmul.f32 %v2550_v0, %v2388_v41  ;;  %v2580_v4 = vmul.f32 %v2550_v0, %v2382_v37 }
 0x8d5   :  { %v1030_v43 = vmul.f32 %v2550_v0, %v2298_v21  ;;  %v1121_v8 = vmul.f32 %v2550_v0, %v2300_v22  ;;  %v1276_v10 = vmul.f32 %v2550_v0, %v2304_v23 }
 0x8f6   :  { %v1027_v60 = vpop.f32.mrf.mxu3 }
 0x8f7   :  { %v2554_v19 = vadd.f32 %v2022_v57, %v1027_v60 }
 0x8f9   :  { %1038 = vrot.lane.b32.xlu1 %v2554_v19, %s2228_s1  ;;  %v1124_v47 = vmul.f32 %v2554_v19, %v2355_v63  ;;  %v2572_v3 = vmul.f32 %v2554_v19, %v2353_v62  ;;  %v2576_v53 = vmul.f32 %v2554_v19, %v2388_v41  ;;  %v2584_v63 = vmul.f32 %v2554_v19, %v2382_v37 }
 0x8fa   :  { %v1031_v49 = vmul.f32 %v2554_v19, %v2298_v21  ;;  %v1122_v9 = vmul.f32 %v2554_v19, %v2300_v22  ;;  %v1277_v34 = vmul.f32 %v2554_v19, %v2304_v23  ;;  %v2619_v21 = vld [vmem:[#allocation5 + $0x230] sm:$0xff] }
 0x8fb   :  { %v1992_v5 = vpack.i.bf16 %v1123_v20, %v1124_v47  ;;  %v1997_v18 = vpack.i.bf16 %v2564_v26, %v2572_v3  ;;  %v2002_v62 = vpack.i.bf16 %v2568_v61, %v2576_v53  ;;  %v2007_v7 = vpack.i.bf16 %v2580_v4, %v2584_v63 }
 0x8fd   :  { %1993 = vrot.lane.b32.xlu2 %v1992_v5, %s2227_s0 }
 0x92e   :  { %v1037_v41 = vpop.permute.xlu2 %1036 }
 0x957   :  { %v1994_v16 = vpop.permute.xlu2 %1993 }
 0x958   :  { %v1995_v38 = vunpack.i.l.bf16 %v1994_v16  ;;  %v1996_v50 = vunpack.i.h.bf16 %v1994_v16 }
 0x95a   :  { %1230 = vmatpush.msrb.mxu3 %v1995_v38 }
 0x95c   :  { %1231 = vmatpush.msrb.mxu3 %v1996_v50 }
 0x96b   :  { %v1039_v37 = vpop.permute.xlu1 %1038 }
 0x96c   :  { %1931 = vmatpush.xpose.msk.msrb.mxu0 %vm86_vm0, %v1039_v37  ;;  %1935 = vmatpush.xpose.msk.msra.mxu1 %vm86_vm0, %v1039_v37 }
 0x96d   :  { %1949 = vmatpush.xpose.msk.msra.mxu3 %vm86_vm0, %v1039_v37 }
 0x970   :  { %1932 = vmatpush.xpose.msk.msrb.mxu0 %vm86_vm0, %v1037_v41  ;;  %1936 = vmatpush.xpose.msk.msra.mxu1 %vm86_vm0, %v1037_v41 }
 0x971   :  { %1950 = vmatpush.xpose.msk.msra.mxu3 %vm86_vm0, %v1037_v41 }
 0x973   :  { %1933 = vmatmul.msk.f32.vlgmr.msrb.gmra.mxu0 %vm86_vm0, %v1030_v43  ;;  %1937 = vmatmul.msk.f32.vlgmr.msra.gmra.mxu1 %vm86_vm0, %v1121_v8 }
 0x974   :  { %1943 = vmatpush.xpose.msk.msrb.mxu1 %vm86_vm0, %v1039_v37 }
 0x978   :  { %1944 = vmatpush.xpose.msk.msrb.mxu1 %vm86_vm0, %v1037_v41 }
 0x97b   :  { %1934 = vmatmul.msk.f32.gmra.mxu0 %vm86_vm0, %v1031_v49  ;;  %1938 = vmatmul.msk.f32.gmra.mxu1 %vm86_vm0, %v1122_v9 }
 0x983   :  { %1945 = vmatmul.msk.f32.vlgmr.msrb.gmra.mxu1 %vm86_vm0, %v1276_v10 }
 0x98b   :  { %1946 = vmatmul.msk.f32.gmra.mxu1 %vm86_vm0, %v1277_v34 }
 0x9f0   :  { %v1067_v13 = vpop.f32.mrf.mxu0  ;;  %v1148_v14 = vpop.f32.mrf.mxu1 }
 0x9f1   :  { %v1149_v22 = vadd.f32 %v2619_v21, %v1148_v14  ;;  %v1068_v40 = vadd.f32 %v2619_v21, %v1067_v13 }
 0x9f3   :  { %v1154_v48 = vsel %vm248_vm13, %v1149_v22, -inf  ;;  %v1073_v45 = vsel %vm248_vm13, %v1068_v40, -inf }
 0x9f4   :  { %1155 = vmax.xlane.f32.xlu0 %v1154_v48 }
 0x9f8   :  { %v1070_v6 = vpop.f32.mrf.mxu0  ;;  %v1151_v15 = vpop.f32.mrf.mxu1 }
 0x9f9   :  { %v2626_v24 = vadd.f32 %v2623_v11, %v1070_v6  ;;  %v1152_v23 = vadd.f32 %v2623_v11, %v1151_v15 }
 0x9fb   :  { %v1157_v28 = vsel %vm248_vm13, %v1152_v23, -inf  ;;  %v1076_v29 = vsel %vm248_vm13, %v2626_v24, -inf }
 0x9fc   :  { %1158 = vmax.xlane.f32.xlu0 %v1157_v28  ;;  %1077 = vmax.xlane.f32.xlu2 %v1076_v29 }
 0xa00   :  { %v1303_v42 = vpop.f32.mrf.mxu1 }
 0xa01   :  { %v1304_v46 = vadd.f32 %v2619_v21, %v1303_v42 }
 0xa03   :  { %v1309_v51 = vsel %vm248_vm13, %v1304_v46, -inf }
 0xa08   :  { %v1306_v52 = vpop.f32.mrf.mxu1 }
 0xa09   :  { %v2639_v31 = vadd.f32 %v2623_v11, %v1306_v52 }
 0xa0b   :  { %v1312_v54 = vsel %vm248_vm13, %v2639_v31, -inf }
 0xa67   :  { %v1156_v27 = vpop.xlane.xlu0 %1155 }
 0xa68   :  { %v1160_v59 = vsub.f32 %v1149_v22, %v1156_v27 }
 0xa6a   :  { %v1162_v33 = vmul.f32 1.442695, %v1160_v59 }
 0xa6c   :  { %2087 = vpow2.f32 %v1162_v33 }
 0xa6f   :  { %v1159_v25 = vpop.xlane.xlu0 %1158  ;;  %v1078_v26 = vpop.xlane.xlu2 %1077 }
 0xa70   :  { %v1161_v1 = vsub.f32 %v1152_v23, %v1159_v25 }
 0xa72   :  { %v2088_v35 = vpop.eup %2087  ;;  %v1164_v36 = vmul.f32 1.442695, %v1161_v1 }
 0xa73   :  { %v1166_v39 = vsel %vm248_vm13, %v2088_v35, 0.0 }
 0xa74   :  { %2089 = vpow2.f32 %v1164_v36  ;;  %1167 = vadd.xlane.f32.xlu0 %v1166_v39  ;;  %v1397_v36 = vmul.f32 %v2554_v19, %v2327_v30 }
 0xa7a   :  { %v2090_v44 = vpop.eup %2089 }
 0xa7b   :  { %v1169_v32 = vsel %vm248_vm13, %v2090_v44, 0.0 }
 0xa7c   :  { %1074 = vmax.xlane.f32.xlu0 %v1073_v45  ;;  %1170 = vadd.xlane.f32.xlu1 %v1169_v32 }
 0xa84   :  { %1310 = vmax.xlane.f32.xlu0 %v1309_v51 }
 0xa8c   :  { %1313 = vmax.xlane.f32.xlu0 %v1312_v54 }
 0xae7   :  { %v1168_v56 = vpop.xlane.xlu0 %1167 }
 0xae8   :  { %2091 = vrcp.f32 %v1168_v56  ;;  %v1183_v47 = vand.u32 2147483648, %v1168_v56  ;;  %v1181_v16 = vand.u32 2147483647, %v1168_v56  ;;  %vm1177_vm15 = vweird.f32 %v1168_v56 }
 0xaea   :  { %v1184_v37 = vor.u32 1.1754944e-38, %v1183_v47  ;;  %vm1182_vm2 = vcmp.eq.f32.partialorder %v1181_v16, 8.507059e+37 }
 0xaee   :  { %v2092_v55 = vpop.eup %2091 }
 0xaef   :  { %v1173_v2 = vmul.f32 %v2092_v55, %v1168_v56  ;;  %v1171_v57 = vpop.xlane.xlu1 %1170  ;;  %v1075_v58 = vpop.xlane.xlu0 %1074  ;;  %vm1178_vm14 = vweird.f32 %v2092_v55 }
 0xaf0   :  { %2093 = vrcp.f32 %v1171_v57  ;;  %v1079_v60 = vsub.f32 %v1068_v40, %v1075_v58  ;;  %vm1179_vm1 = vmor %vm1177_vm15, %vm1178_vm14  ;;  %v1197_v22 = vand.u32 2147483648, %v1171_v57  ;;  %v1195_v23 = vand.u32 2147483647, %v1171_v57 }
 0xaf1   :  { %v1174_v20 = vsub.f32 1.0, %v1173_v2  ;;  %vm1191_vm4 = vweird.f32 %v1171_v57 }
 0xaf2   :  { %v1081_v5 = vmul.f32 1.442695, %v1079_v60  ;;  %v1198_v29 = vor.u32 1.1754944e-38, %v1197_v22  ;;  %vm1196_vm6 = vcmp.eq.f32.partialorder %v1195_v23, 8.507059e+37 }
 0xaf3   :  { %v1175_v41 = vmul.f32 %v2092_v55, %v1174_v20 }
 0xaf4   :  { %2095 = vpow2.f32 %v1081_v5 }
 0xaf5   :  { %v1176_v38 = vadd.f32 %v2092_v55, %v1175_v41 }
 0xaf6   :  { %v2094_v50 = vpop.eup %2093 }
 0xaf7   :  { %v1180_v43 = vsel %vm1179_vm1, %v2092_v55, %v1176_v38  ;;  %v1187_v8 = vmul.f32 %v2094_v50, %v1171_v57  ;;  %v1311_v49 = vpop.xlane.xlu0 %1310  ;;  %vm1192_vm3 = vweird.f32 %v2094_v50  ;;  %v1080_v55 = vsub.f32 %v2626_v24, %v1078_v26 }
 0xaf8   :  { %v1185_v9 = vsel %vm1182_vm2, %v1184_v37, %v1180_v43  ;;  %v1315_v10 = vsub.f32 %v1304_v46, %v1311_v49  ;;  %vm1193_vm5 = vmor %vm1191_vm4, %vm1192_vm3 }
 0xaf9   :  { %v1188_v34 = vsub.f32 1.0, %v1187_v8  ;;  %v1200_v13 = vmul.f32 %v2088_v35, %v1185_v9  ;;  %v1396_v35 = vmul.f32 %v2550_v0, %v2327_v30  ;;  %v1083_v47 = vmul.f32 1.442695, %v1080_v55 }
 0xafa   :  { %v2096_v14 = vpop.eup %2095  ;;  %v1317_v48 = vmul.f32 1.442695, %v1315_v10 }
 0xafb   :  { %v1189_v6 = vmul.f32 %v2094_v50, %v1188_v34  ;;  %1939 = vmatmul.msk.f32.vlgmr.msrb.gmra.mxu3 %vm248_vm13, %v1200_v13  ;;  %v1085_v15 = vsel %vm248_vm13, %v2096_v14, 0.0 }
 0xafc   :  { %2097 = vpow2.f32 %v1317_v48  ;;  %1086 = vadd.xlane.f32.xlu1 %v1085_v15 }
 0xafd   :  { %v1190_v28 = vadd.f32 %v2094_v50, %v1189_v6 }
 0xaff   :  { %v1194_v27 = vsel %vm1193_vm5, %v2094_v50, %v1190_v28  ;;  %v1314_v5 = vpop.xlane.xlu0 %1313 }
 0xb00   :  { %v1199_v59 = vsel %vm1196_vm6, %v1198_v29, %v1194_v27 }
 0xb01   :  { %v1201_v33 = vmul.f32 %v2090_v44, %v1199_v59 }
 0xb02   :  { %v2645_v25 = vpop.eup %2097 }
 0xb03   :  { %1940 = vmatmul.msk.f32.gmra.mxu3 %vm248_vm13, %v1201_v33  ;;  %v1321_v1 = vsel %vm248_vm13, %v2645_v25, 0.0 }
 0xb04   :  { %1322 = vadd.xlane.f32.xlu1 %v1321_v1 }
 0xb0b   :  { %1951 = vmatmul.msk.f32.vlgmr.msra.gmra.mxu3 %vm86_vm0, %v1396_v35 }
 0xb13   :  { %1952 = vmatmul.msk.f32.gmra.mxu3 %vm86_vm0, %v1397_v36 }
 0xb1d   :  { %1998 = vrot.lane.b32.xlu1 %v1997_v18, %s2227_s0 }
 0xb6f   :  { %v1087_v39 = vpop.xlane.xlu1 %1086 }
 0xb70   :  { %2099 = vrcp.f32 %v1087_v39  ;;  %v1102_v19 = vand.u32 2147483648, %v1087_v39  ;;  %vm1096_vm8 = vweird.f32 %v1087_v39  ;;  %v1100_v51 = vand.u32 2147483647, %v1087_v39 }
 0xb71   :  { %2101 = vpow2.f32 %v1083_v47 }
 0xb72   :  { %v1103_v18 = vor.u32 1.1754944e-38, %v1102_v19  ;;  %vm1101_vm10 = vcmp.eq.f32.partialorder %v1100_v51, 8.507059e+37 }
 0xb76   :  { %v2100_v40 = vpop.eup %2099 }
 0xb77   :  { %v1092_v44 = vmul.f32 %v2100_v40, %v1087_v39  ;;  %v2664_v46 = vpop.xlane.xlu1 %1322  ;;  %vm1097_vm7 = vweird.f32 %v2100_v40  ;;  %v2102_v50 = vpop.eup %2101 }
 0xb78   :  { %vm1098_vm9 = vmor %vm1096_vm8, %vm1097_vm7  ;;  %v1088_v37 = vsel %vm248_vm13, %v2102_v50, 0.0  ;;  %vm1332_vm2 = vweird.f32 %v2664_v46  ;;  %v1336_v4 = vand.u32 2147483647, %v2664_v46 }
 0xb79   :  { %v1093_v45 = vsub.f32 1.0, %v1092_v44 }
 0xb7a   :  { %vm1337_vm4 = vcmp.eq.f32.partialorder %v1336_v4, 8.507059e+37 }
 0xb7b   :  { %v1094_v0 = vmul.f32 %v2100_v40, %v1093_v45 }
 0xb7d   :  { %v1095_v30 = vadd.f32 %v2100_v40, %v1094_v0 }
 0xb7e   :  { %v2660_v42 = vpop.f32.mrf.mxu3 }
 0xb7f   :  { %v1099_v3 = vsel %vm1098_vm9, %v2100_v40, %v1095_v30 }
 0xb80   :  { %v1104_v2 = vsel %vm1101_vm10, %v1103_v18, %v1099_v3 }
 0xb81   :  { %v1119_v20 = vmul.f32 %v2096_v14, %v1104_v2 }
 0xb86   :  { %v2662_v32 = vpop.f32.mrf.mxu3 }
 0xb8e   :  { %v1423_v52 = vpop.f32.mrf.mxu3 }
 0xb8f   :  { %v1424_v54 = vadd.f32 %v2619_v21, %v1423_v52  ;;  %v1999_v56 = vpop.permute.xlu1 %1998  ;;  %v1316_v21 = vsub.f32 %v2639_v31, %v1314_v5 }
 0xb90   :  { %v2000_v57 = vunpack.i.l.bf16 %v1999_v56  ;;  %v2001_v60 = vunpack.i.h.bf16 %v1999_v56 }
 0xb91   :  { %v1429_v58 = vsel %vm248_vm13, %v1424_v54, -inf  ;;  %v1319_v38 = vmul.f32 1.442695, %v1316_v21 }
 0xb92   :  { %1430 = vmax.xlane.f32.xlu0 %v1429_v58  ;;  %1267 = vmatpush.msra.mxu0 %v2000_v57 }
 0xb93   :  { %2103 = vpow2.f32 %v1319_v38 }
 0xb94   :  { %1268 = vmatpush.msra.mxu0 %v2001_v60 }
 0xb95   :  { %1941 = vmatmul.msk.f32.vlgmr.msra.gmra.mxu0 %vm248_vm13, %v1119_v20 }
 0xb96   :  { %v1426_v41 = vpop.f32.mrf.mxu3 }
 0xb97   :  { %v1427_v16 = vadd.f32 %v2623_v11, %v1426_v41 }
 0xb99   :  { %v1432_v24 = vsel %vm248_vm13, %v1427_v16, -inf  ;;  %v2674_v43 = vpop.eup %2103 }
 0xb9a   :  { %1433 = vmax.xlane.f32.xlu0 %v1432_v24  ;;  %v1324_v8 = vsel %vm248_vm13, %v2674_v43, 0.0 }
 0xba2   :  { %1089 = vadd.xlane.f32.xlu0 %v1088_v37 }
 0xbaa   :  { %1325 = vadd.xlane.f32.xlu0 %v1324_v8 }
 0xc05   :  { %v1431_v49 = vpop.xlane.xlu0 %1430 }
 0xc06   :  { %v1435_v11 = vsub.f32 %v1424_v54, %v1431_v49 }
 0xc08   :  { %v1437_v9 = vmul.f32 1.442695, %v1435_v11 }
 0xc0a   :  { %2105 = vpow2.f32 %v1437_v9 }
 0xc0d   :  { %v1434_v31 = vpop.xlane.xlu0 %1433 }
 0xc0e   :  { %v1436_v10 = vsub.f32 %v1427_v16, %v1434_v31 }
 0xc10   :  { %v2678_v34 = vpop.eup %2105  ;;  %v1439_v13 = vmul.f32 1.442695, %v1436_v10 }
 0xc11   :  { %v1441_v14 = vsel %vm248_vm13, %v2678_v34, 0.0 }
 0xc12   :  { %2107 = vpow2.f32 %v1439_v13  ;;  %1442 = vadd.xlane.f32.xlu2 %v1441_v14 }
 0xc15   :  { %v1090_v22 = vpop.xlane.xlu0 %1089 }
 0xc16   :  { %2109 = vrcp.f32 %v1090_v22  ;;  %v1116_v29 = vand.u32 2147483648, %v1090_v22  ;;  %v1114_v59 = vand.u32 2147483647, %v1090_v22  ;;  %vm1110_vm12 = vweird.f32 %v1090_v22 }
 0xc17   :  { %2111 = vrcp.f32 %v2664_v46 }
 0xc18   :  { %v2682_v48 = vpop.eup %2107  ;;  %v1117_v1 = vor.u32 1.1754944e-38, %v1116_v29  ;;  %vm1115_vm15 = vcmp.eq.f32.partialorder %v1114_v59, 8.507059e+37 }
 0xc19   :  { %v1444_v6 = vsel %vm248_vm13, %v2682_v48, 0.0 }
 0xc1a   :  { %1445 = vadd.xlane.f32.xlu0 %v1444_v6 }
 0xc1c   :  { %v2110_v15 = vpop.eup %2109 }
 0xc1d   :  { %v1106_v23 = vmul.f32 %v2110_v15, %v1090_v22  ;;  %vm1111_vm11 = vweird.f32 %v2110_v15  ;;  %v1326_v40 = vpop.xlane.xlu0 %1325  ;;  %v2112_v44 = vpop.eup %2111 }
 0xc1e   :  { %vm1112_vm14 = vmor %vm1110_vm12, %vm1111_vm11  ;;  %2113 = vrcp.f32 %v1326_v40  ;;  %v1328_v45 = vmul.f32 %v2112_v44, %v2664_v46  ;;  %vm1333_vm1 = vweird.f32 %v2112_v44  ;;  %v1352_v58 = vand.u32 2147483648, %v1326_v40 }
 0xc1f   :  { %v1107_v28 = vsub.f32 1.0, %v1106_v23  ;;  %vm1334_vm3 = vmor %vm1332_vm2, %vm1333_vm1  ;;  %vm1346_vm6 = vweird.f32 %v1326_v40  ;;  %v1350_v47 = vand.u32 2147483647, %v1326_v40 }
 0xc20   :  { %v1329_v0 = vsub.f32 1.0, %v1328_v45  ;;  %v1353_v16 = vor.u32 1.1754944e-38, %v1352_v58 }
 0xc21   :  { %v1108_v27 = vmul.f32 %v2110_v15, %v1107_v28  ;;  %vm1351_vm8 = vcmp.eq.f32.partialorder %v1350_v47, 8.507059e+37 }
 0xc22   :  { %v1330_v19 = vmul.f32 %v2112_v44, %v1329_v0 }
 0xc23   :  { %v1109_v33 = vadd.f32 %v2110_v15, %v1108_v27 }
 0xc24   :  { %v2114_v30 = vpop.eup %2113  ;;  %v1331_v61 = vadd.f32 %v2112_v44, %v1330_v19 }
 0xc25   :  { %v1113_v35 = vsel %vm1112_vm14, %v2110_v15, %v1109_v33  ;;  %v1342_v51 = vmul.f32 %v2114_v30, %v1326_v40  ;;  %vm1347_vm5 = vweird.f32 %v2114_v30  ;;  %v894_v33 = vld [vmem:[#allocation5 + $0x140] sm:$0xff] }
 0xc26   :  { %v1118_v36 = vsel %vm1115_vm15, %v1117_v1, %v1113_v35  ;;  %vm1348_vm7 = vmor %vm1346_vm6, %vm1347_vm5  ;;  %1535 = vmatpush.msra.mxu1 %v894_v33  ;;  %v893_v1 = vld [vmem:[#allocation5 + $0x138] sm:$0xff]  ;;  %v892_v35 = vld [vmem:[#allocation5 + $0x130] sm:$0xff] }
 0xc27   :  { %v1120_v39 = vmul.f32 %v2102_v50, %v1118_v36  ;;  %v1343_v53 = vsub.f32 1.0, %v1342_v51  ;;  %v1270_v36 = vpop.f32.mrf.mxu0 }
 0xc28   :  { %1536 = vmatpush.msra.mxu1 %v893_v1  ;;  %v913_v1 = vld [vmem:[#allocation5 + $0x1d8] sm:$0xff] }
 0xc29   :  { %1942 = vmatmul.msk.f32.gmra.mxu0 %vm248_vm13, %v1120_v39  ;;  %v1344_v3 = vmul.f32 %v2114_v30, %v1343_v53  ;;  %v2023_v53 = vld [vmem:[#allocation5 + $0x148] ss:$0 sm:$0xff] }
 0xc2a   :  { %2003 = vrot.lane.b32.xlu2 %v2002_v62, %s2227_s0  ;;  %v1338_v62 = vand.u32 2147483648, %v2664_v46  ;;  %1537 = vmatpush.msra.mxu1 %v892_v35 }
 0xc2b   :  { %v1345_v57 = vadd.f32 %v2114_v30, %v1344_v3 }
 0xc2c   :  { %v1339_v18 = vor.u32 1.1754944e-38, %v1338_v62 }
 0xc2d   :  { %v1349_v41 = vsel %vm1348_vm7, %v2114_v30, %v1345_v57 }
 0xc2e   :  { %2008 = vrot.lane.b32.xlu0 %v2007_v7, %s2227_s0  ;;  %v1335_v7 = vsel %vm1334_vm3, %v2112_v44, %v1331_v61  ;;  %v1354_v38 = vsel %vm1351_vm8, %v1353_v16, %v1349_v41  ;;  %v1271_v44 = vadd.f32 %v1270_v36, %v2660_v42  ;;  %v896_v16 = vld [vmem:[#allocation5 + $0x150] sm:$0xff] }
 0xc2f   :  { %v1340_v55 = vsel %vm1337_vm4, %v1339_v18, %v1335_v7  ;;  %v1356_v8 = vmul.f32 %v2674_v43, %v1354_v38  ;;  %v912_v36 = vld [vmem:[#allocation5 + $0x1d0] sm:$0xff] }
 0xc30   :  { %v1355_v46 = vmul.f32 %v2645_v25, %v1340_v55 }
 0xc85   :  { %v1443_v26 = vpop.xlane.xlu2 %1442 }
 0xc86   :  { %2115 = vrcp.f32 %v1443_v26  ;;  %v1458_v49 = vand.u32 2147483648, %v1443_v26  ;;  %vm1452_vm10 = vweird.f32 %v1443_v26  ;;  %v1456_v25 = vand.u32 2147483647, %v1443_v26 }
 0xc88   :  { %v1459_v31 = vor.u32 1.1754944e-38, %v1458_v49  ;;  %vm1457_vm12 = vcmp.eq.f32.partialorder %v1456_v25, 8.507059e+37 }
 0xc8c   :  { %v2116_v63 = vpop.eup %2115 }
 0xc8d   :  { %v1446_v52 = vpop.xlane.xlu0 %1445  ;;  %v2004_v54 = vpop.permute.xlu2 %2003  ;;  %v1448_v56 = vmul.f32 %v2116_v63, %v1443_v26  ;;  %vm1453_vm9 = vweird.f32 %v2116_v63 }
 0xc8e   :  { %2117 = vrcp.f32 %v1446_v52  ;;  %v2005_v2 = vunpack.i.l.bf16 %v2004_v54  ;;  %v2006_v60 = vunpack.i.h.bf16 %v2004_v54  ;;  %vm1454_vm11 = vmor %vm1452_vm10, %vm1453_vm9  ;;  %v1472_v6 = vand.u32 2147483648, %v1446_v52 }
 0xc8f   :  { %v1449_v20 = vsub.f32 1.0, %v1448_v56  ;;  %vm1466_vm15 = vweird.f32 %v1446_v52  ;;  %v1470_v23 = vand.u32 2147483647, %v1446_v52 }
 0xc90   :  { %1385 = vmatpush.msra.mxu2 %v2005_v2  ;;  %v1473_v29 = vor.u32 1.1754944e-38, %v1472_v6 }
 0xc91   :  { %v1450_v21 = vmul.f32 %v2116_v63, %v1449_v20  ;;  %vm1471_vm2 = vcmp.eq.f32.partialorder %v1470_v23, 8.507059e+37  ;;  %v899_v20 = vld [vmem:[#allocation5 + $0x168] sm:$0xff]  ;;  %v916_v23 = vld [vmem:[#allocation5 + $0x1f0] sm:$0xff] }
 0xc92   :  { %1386 = vmatpush.msra.mxu2 %v2006_v60  ;;  %1663 = vmatpush.msrb.mxu3 %v916_v23 }
 0xc93   :  { %1947 = vmatmul.msk.f32.vlgmr.msra.gmra.mxu2 %vm248_vm13, %v1355_v46  ;;  %v1451_v50 = vadd.f32 %v2116_v63, %v1450_v21  ;;  %v898_v46 = vld [vmem:[#allocation5 + $0x160] sm:$0xff] }
 0xc94   :  { %v2118_v5 = vpop.eup %2117  ;;  %1649 = vmatpush.msrb.mxu2 %v899_v20 }
 0xc95   :  { %v1462_v24 = vmul.f32 %v2118_v5, %v1446_v52  ;;  %v1455_v11 = vsel %vm1454_vm11, %v2116_v63, %v1451_v50  ;;  %vm1467_vm14 = vweird.f32 %v2118_v5 }
 0xc96   :  { %v1460_v13 = vsel %vm1457_vm12, %v1459_v31, %v1455_v11  ;;  %vm1468_vm1 = vmor %vm1466_vm15, %vm1467_vm14  ;;  %1650 = vmatpush.msrb.mxu2 %v898_v46  ;;  %v905_v46 = vld [vmem:[#allocation5 + $0x198] sm:$0xff] }
 0xc97   :  { %v1463_v37 = vsub.f32 1.0, %v1462_v24  ;;  %v1475_v43 = vmul.f32 %v2678_v34, %v1460_v13  ;;  %v891_v34 = vld [vmem:[#allocation5 + $0x128] sm:$0xff] }
 0xc98   :  { %1538 = vmatpush.msra.mxu1 %v891_v34 }
 0xc99   :  { %v1464_v9 = vmul.f32 %v2118_v5, %v1463_v37 }
 0xc9b   :  { %1948 = vmatmul.msk.f32.gmra.mxu2 %vm248_vm13, %v1356_v8  ;;  %v1465_v22 = vadd.f32 %v2118_v5, %v1464_v9 }
 0xc9d   :  { %v1469_v28 = vsel %vm1468_vm1, %v2118_v5, %v1465_v22  ;;  %v897_v5 = vld [vmem:[#allocation5 + $0x158] sm:$0xff] }
 0xc9e   :  { %v1474_v27 = vsel %vm1471_vm2, %v1473_v29, %v1469_v28  ;;  %1651 = vmatpush.msrb.mxu2 %v897_v5  ;;  %v915_v28 = vld [vmem:[#allocation5 + $0x1e8] sm:$0xff] }
 0xc9f   :  { %v1476_v59 = vmul.f32 %v2682_v48, %v1474_v27  ;;  %v914_v27 = vld [vmem:[#allocation5 + $0x1e0] sm:$0xff]  ;;  %1664 = vmatpush.msrb.mxu3 %v915_v28 }
 0xca0   :  { %v2009_v10 = vpop.permute.xlu0 %2008  ;;  %1652 = vmatpush.msrb.mxu2 %v896_v16 }
 0xca1   :  { %v2010_v14 = vunpack.i.l.bf16 %v2009_v10  ;;  %v2011_v15 = vunpack.i.h.bf16 %v2009_v10  ;;  %1665 = vmatpush.msrb.mxu3 %v914_v27 }
 0xca3   :  { %1505 = vmatpush.msrb.mxu0 %v2010_v14  ;;  %1666 = vmatpush.msrb.mxu3 %v913_v1 }
 0xca5   :  { %1506 = vmatpush.msrb.mxu0 %v2011_v15  ;;  %1667 = vmatpush.msrb.mxu3 %v912_v36 }
 0xca6   :  { %1953 = vmatmul.msk.f32.vlgmr.msrb.gmra.mxu0 %vm248_vm13, %v1475_v43  ;;  %v1273_v39 = vpop.f32.mrf.mxu0 }
 0xca7   :  { %v1274_v19 = vadd.f32 %v1273_v39, %v2662_v32 }
 0xcae   :  { %1954 = vmatmul.msk.f32.gmra.mxu0 %vm248_vm13, %v1476_v59 }
 0xd16   :  { %v1388_v40 = vpop.f32.mrf.mxu2 }
 0xd17   :  { %v1394_v45 = vadd.f32 %v1388_v40, %v1271_v44 }
 0xd1e   :  { %v1391_v48 = vpop.f32.mrf.mxu2 }
 0xd1f   :  { %v1395_v51 = vadd.f32 %v1391_v48, %v1274_v19 }
 0xd23   :  { %v1508_v0 = vpop.f32.mrf.mxu0 }
 0xd24   :  { %v1514_v30 = vadd.f32 %v1508_v0, %v1394_v45  ;;  %v911_v45 = vld [vmem:[#allocation5 + $0x1c8] sm:$0xff] }
 0xd25   :  { %1668 = vmatpush.msrb.mxu3 %v911_v45  ;;  %v1774_v45 = vld [vmem:[#allocation5 + $0x210] sm:$0xff] }
 0xd26   :  { %1955 = vmatmul.msk.f32.vlgmr.msra.gmra.mxu1 %vm86_vm0, %v1514_v30  ;;  %v910_v30 = vld [vmem:[#allocation5 + $0x1c0] sm:$0xff] }
 0xd27   :  { %1669 = vmatpush.msrb.mxu3 %v910_v30  ;;  %v1773_v30 = vld [vmem:[#allocation5 + $0x208] sm:$0xff] }
 0xd2b   :  { %v1511_v26 = vpop.f32.mrf.mxu0 }
 0xd2c   :  { %v1515_v61 = vadd.f32 %v1511_v26, %v1395_v51  ;;  %v909_v26 = vld [vmem:[#allocation5 + $0x1b8] sm:$0xff] }
 0xd2d   :  { %1670 = vmatpush.msrb.mxu3 %v909_v26 }
 0xd2e   :  { %1956 = vmatmul.msk.f32.gmra.mxu1 %vm86_vm0, %v1515_v61 }
 0xda3   :  { %v1540_v62 = vpop.f32.mrf.mxu1 }
 0xda4   :  { %v1541_v4 = vadd.f32 %v2023_v53, %v1540_v62  ;;  %v908_v62 = vld [vmem:[#allocation5 + $0x1b0] sm:$0xff] }
 0xda5   :  { %1671 = vmatpush.msrb.mxu3 %v908_v62 }
 0xda6   :  { %v2713_v63 = vadd.f32 %v1541_v4, %v2530_v12 }
 0xda8   :  { %v1548_v42 = vsel %vm86_vm0, %v2713_v63, 0.0 }
 0xda9   :  { %1549 = vadd.xlane.f32.xlu1 %v1548_v42 }
 0xdab   :  { %v1543_v7 = vpop.f32.mrf.mxu1 }
 0xdac   :  { %v1544_v3 = vadd.f32 %v2023_v53, %v1543_v7  ;;  %v2024_v53 = vld [vmem:[#allocation5 + $0x123] ss:$0 sm:$0xff] }
 0xdae   :  { %v2718_v18 = vadd.f32 %v1544_v3, %v2535_v17 }
 0xdb0   :  { %v1551_v32 = vsel %vm86_vm0, %v2718_v18, 0.0 }
 0xdb1   :  { %1552 = vadd.xlane.f32.xlu2 %v1551_v32  ;;  %v907_v32 = vld [vmem:[#allocation5 + $0x1a8] sm:$0xff] }
 0xdb2   :  { %1672 = vmatpush.msrb.mxu3 %v907_v32 }
 0xe1c   :  { %v1550_v52 = vpop.xlane.xlu1 %1549 }
 0xe1d   :  { %v1554_v54 = vmul.f32 0.03125, %v1550_v52 }
 0xe1f   :  { %v2723_v56 = vsub.f32 %v2713_v63, %v1554_v54 }
 0xe21   :  { %v1558_v12 = vmul.f32 %v2723_v56, %v2723_v56 }
 0xe23   :  { %v1560_v55 = vsel %vm86_vm0, %v1558_v12, 0.0  ;;  %v2025_v12 = vld [vmem:[#allocation5 + $0x124] ss:$0 sm:$0xff] }
 0xe24   :  { %1561 = vadd.xlane.f32.xlu0 %v1560_v55  ;;  %v1553_v2 = vpop.xlane.xlu2 %1552 }
 0xe25   :  { %v1555_v57 = vmul.f32 0.03125, %v1553_v2  ;;  %v906_v2 = vld [vmem:[#allocation5 + $0x1a0] sm:$0xff] }
 0xe26   :  { %1673 = vmatpush.msrb.mxu3 %v906_v2 }
 0xe27   :  { %v2729_v17 = vsub.f32 %v2718_v18, %v1555_v57 }
 0xe28   :  { %1674 = vmatpush.msrb.mxu3 %v905_v46 }
 0xe29   :  { %v1559_v58 = vmul.f32 %v2729_v17, %v2729_v17 }
 0xe2b   :  { %v1563_v60 = vsel %vm86_vm0, %v1559_v58, 0.0 }
 0xe2c   :  { %1564 = vadd.xlane.f32.xlu1 %v1563_v60 }
 0xe97   :  { %v1562_v47 = vpop.xlane.xlu0 %1561 }
 0xe98   :  { %v1566_v41 = vmul.f32 0.032258064, %v1562_v47 }
 0xe9a   :  { %2119 = vrsqrt.f32 %v1566_v41  ;;  %vm1575_vm13 = vcmp.eq.f32.partialorder %v1566_v41, inf  ;;  %v1578_v13 = vand.u32 2147483648, %v1566_v41  ;;  %vm1577_vm3 = vcmp.eq.f32.partialorder %v1566_v41, 0.0 }
 0xe9f   :  { %v1565_v21 = vpop.xlane.xlu1 %1564 }
 0xea0   :  { %v2120_v24 = vpop.eup %2119  ;;  %v1567_v38 = vmul.f32 0.032258064, %v1565_v21 }
 0xea1   :  { %v1569_v50 = vmul.f32 %v2120_v24, %v1566_v41 }
 0xea2   :  { %2121 = vrsqrt.f32 %v1567_v38  ;;  %vm1587_vm4 = vcmp.eq.f32.partialorder %v1567_v38, inf  ;;  %v1590_v33 = vand.u32 2147483648, %v1567_v38  ;;  %vm1589_vm5 = vcmp.eq.f32.partialorder %v1567_v38, 0.0 }
 0xea3   :  { %v1570_v37 = vmul.f32 %v2120_v24, %v1569_v50 }
 0xea5   :  { %v1571_v8 = vmul.f32 0.5, %v1570_v37  ;;  %v903_v37 = vld [vmem:[#allocation5 + $0x188] sm:$0xff] }
 0xea7   :  { %v1572_v49 = vsub.f32 1.5, %v1571_v8  ;;  %v902_v8 = vld [vmem:[#allocation5 + $0x180] sm:$0xff] }
 0xea8   :  { %v2122_v25 = vpop.eup %2121 }
 0xea9   :  { %v1573_v11 = vmul.f32 %v2120_v24, %v1572_v49  ;;  %v1581_v9 = vmul.f32 %v2122_v25, %v1567_v38  ;;  %v901_v49 = vld [vmem:[#allocation5 + $0x178] sm:$0xff] }
 0xeab   :  { %v1574_v31 = vmul.f32 %v1573_v11, %v1566_v41  ;;  %v1582_v10 = vmul.f32 %v2122_v25, %v1581_v9 }
 0xead   :  { %v1576_v14 = vsel %vm1575_vm13, %v1566_v41, %v1574_v31  ;;  %v1583_v22 = vmul.f32 0.5, %v1582_v10  ;;  %v904_v41 = vld [vmem:[#allocation5 + $0x190] sm:$0xff] }
 0xeae   :  { %v1579_v6 = vsel %vm1577_vm3, %v1578_v13, %v1576_v14  ;;  %1675 = vmatpush.msrb.mxu3 %v904_v41 }
 0xeaf   :  { %v1592_v15 = vadd.f32 1e-06, %v1579_v6  ;;  %v1584_v43 = vsub.f32 1.5, %v1583_v22  ;;  %v2027_v22 = vld [vmem:[#allocation5 + $0x1f8] ss:$0 sm:$0xff] }
 0xeb0   :  { %1676 = vmatpush.msrb.mxu3 %v903_v37 }
 0xeb1   :  { %2123 = vrcp.f32 %v1592_v15  ;;  %v1585_v29 = vmul.f32 %v2122_v25, %v1584_v43  ;;  %v1605_v48 = vand.u32 2147483648, %v1592_v15  ;;  %v1603_v51 = vand.u32 2147483647, %v1592_v15  ;;  %v2026_v25 = vld [vmem:[#allocation5 + $0x170] ss:$0 sm:$0xff] }
 0xeb2   :  { %vm1599_vm7 = vweird.f32 %v1592_v15  ;;  %1677 = vmatpush.msrb.mxu3 %v902_v8 }
 0xeb3   :  { %v1586_v59 = vmul.f32 %v1585_v29, %v1567_v38  ;;  %v1606_v42 = vor.u32 1.1754944e-38, %v1605_v48  ;;  %vm1604_vm9 = vcmp.eq.f32.partialorder %v1603_v51, 8.507059e+37 }
 0xeb4   :  { %1678 = vmatpush.msrb.mxu3 %v901_v49  ;;  %v2028_v49 = vld [vmem:[#allocation5 + $0x221] ss:$0 sm:$0xff] }
 0xeb5   :  { %v1588_v35 = vsel %vm1587_vm4, %v1567_v38, %v1586_v59 }
 0xeb6   :  { %v1591_v34 = vsel %vm1589_vm5, %v1590_v33, %v1588_v35 }
 0xeb7   :  { %v2124_v39 = vpop.eup %2123  ;;  %v1593_v40 = vadd.f32 1e-06, %v1591_v34 }
 0xeb8   :  { %v1595_v44 = vmul.f32 %v2124_v39, %v1592_v15  ;;  %vm1600_vm6 = vweird.f32 %v2124_v39 }
 0xeb9   :  { %2125 = vrcp.f32 %v1593_v40  ;;  %vm1601_vm8 = vmor %vm1599_vm7, %vm1600_vm6  ;;  %v1619_v57 = vand.u32 2147483648, %v1593_v40  ;;  %v1617_v20 = vand.u32 2147483647, %v1593_v40  ;;  %vm1613_vm11 = vweird.f32 %v1593_v40 }
 0xeba   :  { %v1596_v0 = vsub.f32 1.0, %v1595_v44  ;;  %v1775_v44 = vld [vmem:[#allocation5 + $0x218] sm:$0xff] }
 0xebb   :  { %v1620_v16 = vor.u32 1.1754944e-38, %v1619_v57  ;;  %vm1618_vm14 = vcmp.eq.f32.partialorder %v1617_v20, 8.507059e+37  ;;  %1796 = vmatpush.msra.mxu0 %v1775_v44 }
 0xebc   :  { %v1597_v19 = vmul.f32 %v2124_v39, %v1596_v0 }
 0xebd   :  { %1797 = vmatpush.msra.mxu0 %v1774_v45 }
 0xebe   :  { %v1598_v61 = vadd.f32 %v2124_v39, %v1597_v19  ;;  %v1772_v19 = vld [vmem:[#allocation5 + $0x200] sm:$0xff] }
 0xebf   :  { %v2126_v4 = vpop.eup %2125  ;;  %1798 = vmatpush.msra.mxu0 %v1773_v30 }
 0xec0   :  { %v1602_v7 = vsel %vm1601_vm8, %v2124_v39, %v1598_v61  ;;  %v1609_v3 = vmul.f32 %v2126_v4, %v1593_v40  ;;  %vm1614_vm10 = vweird.f32 %v2126_v4 }
 0xec1   :  { %v1607_v52 = vsel %vm1604_vm9, %v1606_v42, %v1602_v7  ;;  %vm1615_vm12 = vmor %vm1613_vm11, %vm1614_vm10  ;;  %1799 = vmatpush.msra.mxu0 %v1772_v19 }
 0xec2   :  { %v1623_v54 = vmul.f32 %v2024_v53, %v1607_v52  ;;  %v1610_v55 = vsub.f32 1.0, %v1609_v3 }
 0xec4   :  { %v1625_v58 = vmul.f32 %v1623_v54, %v2723_v56  ;;  %v1611_v60 = vmul.f32 %v2126_v4, %v1610_v55 }
 0xec6   :  { %v1628_v47 = vadd.f32 %v2025_v12, %v1625_v58  ;;  %v1612_v5 = vadd.f32 %v2126_v4, %v1611_v60 }
 0xec8   :  { %1957 = vmatmul.msk.f32.vlgmr.msrb.gmra.mxu2 %vm86_vm0, %v1628_v47  ;;  %v1616_v21 = vsel %vm1615_vm12, %v2126_v4, %v1612_v5 }
 0xec9   :  { %v1621_v24 = vsel %vm1618_vm14, %v1620_v16, %v1616_v21 }
 0xeca   :  { %v1624_v38 = vmul.f32 %v2024_v53, %v1621_v24 }
 0xecc   :  { %v1626_v56 = vmul.f32 %v1624_v38, %v2729_v17 }
 0xece   :  { %v1629_v50 = vadd.f32 %v2025_v12, %v1626_v56 }
 0xed0   :  { %1958 = vmatmul.msk.f32.gmra.mxu2 %vm86_vm0, %v1629_v50 }
 0xf4b   :  { %v1654_v11 = vpop.f32.mrf.mxu2 }
 0xf4c   :  { %v1655_v9 = vadd.f32 %v2026_v25, %v1654_v11 }
 0xf4e   :  { %v1660_v31 = vmax.f32 %v1655_v9, 0.0 }
 0xf50   :  { %1679 = vmatmul.f32.vlgmr.msrb.gmra.mxu3 %v1660_v31 }
 0xf53   :  { %v1657_v10 = vpop.f32.mrf.mxu2 }
 0xf54   :  { %v1658_v13 = vadd.f32 %v2026_v25, %v1657_v10 }
 0xf56   :  { %v1661_v14 = vmax.f32 %v1658_v13, 0.0 }
 0xf58   :  { %1682 = vmatmul.f32.gmra.mxu3 %v1661_v14  ;;  %v2029_v14 = vld [vmem:[#allocation5 + $0x222] ss:$0 sm:$0xff] }
 0xfd3   :  { %v1680_v17 = vpop.f32.mrf.mxu3 }
 0xfd4   :  { %v1681_v6 = vadd.f32 %v2027_v22, %v1680_v17 }
 0xfd6   :  { %v1686_v15 = vadd.f32 %v1681_v6, %v2713_v63 }
 0xfd8   :  { %v1690_v43 = vsel %vm86_vm0, %v1686_v15, 0.0 }
 0xfd9   :  { %1691 = vadd.xlane.f32.xlu2 %v1690_v43 }
 0xfdb   :  { %v1683_v23 = vpop.f32.mrf.mxu3 }
 0xfdc   :  { %v1684_v28 = vadd.f32 %v2027_v22, %v1683_v23 }
 0xfde   :  { %v1687_v29 = vadd.f32 %v1684_v28, %v2718_v18 }
 0xfe0   :  { %v1693_v27 = vsel %vm86_vm0, %v1687_v29, 0.0 }
 0xfe1   :  { %1694 = vadd.xlane.f32.xlu0 %v1693_v27 }
0x104c   :  { %v1692_v59 = vpop.xlane.xlu2 %1691 }
0x104d   :  { %v1696_v33 = vmul.f32 0.03125, %v1692_v59 }
0x104f   :  { %v2742_v1 = vsub.f32 %v1686_v15, %v1696_v33 }
0x1051   :  { %v1700_v35 = vmul.f32 %v2742_v1, %v2742_v1 }
0x1053   :  { %v1702_v34 = vsel %vm86_vm0, %v1700_v35, 0.0 }
0x1054   :  { %v1695_v63 = vpop.xlane.xlu0 %1694  ;;  %1703 = vadd.xlane.f32.xlu1 %v1702_v34 }
0x1055   :  { %v1697_v36 = vmul.f32 0.03125, %v1695_v63 }
0x1057   :  { %v2747_v39 = vsub.f32 %v1687_v29, %v1697_v36 }
0x1059   :  { %v1701_v18 = vmul.f32 %v2747_v39, %v2747_v39 }
0x105b   :  { %v1705_v40 = vsel %vm86_vm0, %v1701_v18, 0.0 }
0x105c   :  { %1706 = vadd.xlane.f32.xlu2 %v1705_v40 }
0x10c7   :  { %v1704_v0 = vpop.xlane.xlu1 %1703 }
0x10c8   :  { %v1708_v48 = vmul.f32 0.032258064, %v1704_v0 }
0x10ca   :  { %2127 = vrsqrt.f32 %v1708_v48  ;;  %vm1717_vm15 = vcmp.eq.f32.partialorder %v1708_v48, inf  ;;  %v1720_v12 = vand.u32 2147483648, %v1708_v48  ;;  %vm1719_vm1 = vcmp.eq.f32.partialorder %v1708_v48, 0.0 }
0x10cf   :  { %v1707_v51 = vpop.xlane.xlu2 %1706 }
0x10d0   :  { %v2128_v26 = vpop.eup %2127  ;;  %v1709_v61 = vmul.f32 0.032258064, %v1707_v51 }
0x10d1   :  { %v1711_v53 = vmul.f32 %v2128_v26, %v1708_v48 }
0x10d2   :  { %2129 = vrsqrt.f32 %v1709_v61  ;;  %vm1729_vm2 = vcmp.eq.f32.partialorder %v1709_v61, inf  ;;  %v1732_v47 = vand.u32 2147483648, %v1709_v61  ;;  %vm1731_vm13 = vcmp.eq.f32.partialorder %v1709_v61, 0.0 }
0x10d3   :  { %v1712_v62 = vmul.f32 %v2128_v26, %v1711_v53 }
0x10d5   :  { %v1713_v4 = vmul.f32 0.5, %v1712_v62 }
0x10d7   :  { %v1714_v42 = vsub.f32 1.5, %v1713_v4 }
0x10d8   :  { %v2130_v7 = vpop.eup %2129 }
0x10d9   :  { %v1715_v3 = vmul.f32 %v2128_v26, %v1714_v42  ;;  %v1723_v32 = vmul.f32 %v2130_v7, %v1709_v61 }
0x10db   :  { %v1716_v52 = vmul.f32 %v1715_v3, %v1708_v48  ;;  %v1724_v54 = vmul.f32 %v2130_v7, %v1723_v32 }
0x10dd   :  { %v1718_v55 = vsel %vm1717_vm15, %v1708_v48, %v1716_v52  ;;  %v1725_v2 = vmul.f32 0.5, %v1724_v54 }
0x10de   :  { %v1721_v57 = vsel %vm1719_vm1, %v1720_v12, %v1718_v55 }
0x10df   :  { %v1734_v58 = vadd.f32 1e-06, %v1721_v57  ;;  %v1726_v60 = vsub.f32 1.5, %v1725_v2 }
0x10e1   :  { %2131 = vrcp.f32 %v1734_v58  ;;  %v1727_v20 = vmul.f32 %v2130_v7, %v1726_v60  ;;  %v1747_v56 = vand.u32 2147483648, %v1734_v58  ;;  %v1745_v37 = vand.u32 2147483647, %v1734_v58 }
0x10e2   :  { %vm1741_vm4 = vweird.f32 %v1734_v58 }
0x10e3   :  { %v1728_v46 = vmul.f32 %v1727_v20, %v1709_v61  ;;  %v1748_v11 = vor.u32 1.1754944e-38, %v1747_v56  ;;  %vm1746_vm6 = vcmp.eq.f32.partialorder %v1745_v37, 8.507059e+37 }
0x10e5   :  { %v1730_v5 = vsel %vm1729_vm2, %v1709_v61, %v1728_v46 }
0x10e6   :  { %v1733_v41 = vsel %vm1731_vm13, %v1732_v47, %v1730_v5 }
0x10e7   :  { %v2132_v16 = vpop.eup %2131  ;;  %v1735_v21 = vadd.f32 1e-06, %v1733_v41 }
0x10e8   :  { %v1737_v24 = vmul.f32 %v2132_v16, %v1734_v58  ;;  %vm1742_vm3 = vweird.f32 %v2132_v16 }
0x10e9   :  { %2133 = vrcp.f32 %v1735_v21  ;;  %vm1743_vm5 = vmor %vm1741_vm4, %vm1742_vm3  ;;  %v1761_v17 = vand.u32 2147483648, %v1735_v21  ;;  %v1759_v43 = vand.u32 2147483647, %v1735_v21  ;;  %vm1755_vm8 = vweird.f32 %v1735_v21 }
0x10ea   :  { %v1738_v38 = vsub.f32 1.0, %v1737_v24 }
0x10eb   :  { %v1762_v29 = vor.u32 1.1754944e-38, %v1761_v17  ;;  %vm1760_vm10 = vcmp.eq.f32.partialorder %v1759_v43, 8.507059e+37 }
0x10ec   :  { %v1739_v50 = vmul.f32 %v2132_v16, %v1738_v38 }
0x10ee   :  { %v1740_v8 = vadd.f32 %v2132_v16, %v1739_v50 }
0x10ef   :  { %v2134_v25 = vpop.eup %2133 }
0x10f0   :  { %v1744_v9 = vsel %vm1743_vm5, %v2132_v16, %v1740_v8  ;;  %v1751_v31 = vmul.f32 %v2134_v25, %v1735_v21  ;;  %vm1756_vm7 = vweird.f32 %v2134_v25 }
0x10f1   :  { %v1749_v10 = vsel %vm1746_vm6, %v1748_v11, %v1744_v9  ;;  %vm1757_vm9 = vmor %vm1755_vm8, %vm1756_vm7 }
0x10f2   :  { %v1765_v13 = vmul.f32 %v2028_v49, %v1749_v10  ;;  %v1752_v22 = vsub.f32 1.0, %v1751_v31 }
0x10f4   :  { %v1767_v6 = vmul.f32 %v1765_v13, %v2742_v1  ;;  %v1753_v15 = vmul.f32 %v2134_v25, %v1752_v22  ;;  %v2030_v1 = vld [vmem:[#allocation5 + $0x220] ss:$0 sm:$0xff] }
0x10f6   :  { %v1770_v23 = vadd.f32 %v2029_v14, %v1767_v6  ;;  %v1754_v28 = vadd.f32 %v2134_v25, %v1753_v15 }
0x10f8   :  { %1959 = vmatmul.msk.f32.vlgmr.msra.gmra.mxu0 %vm86_vm0, %v1770_v23  ;;  %v1758_v27 = vsel %vm1757_vm9, %v2134_v25, %v1754_v28 }
0x10f9   :  { %v1763_v59 = vsel %vm1760_vm10, %v1762_v29, %v1758_v27 }
0x10fa   :  { %v1766_v33 = vmul.f32 %v2028_v49, %v1763_v59 }
0x10fc   :  { %v1768_v35 = vmul.f32 %v1766_v33, %v2747_v39 }
0x10fe   :  { %v1771_v34 = vadd.f32 %v2029_v14, %v1768_v35 }
0x1100   :  { %1960 = vmatmul.msk.f32.gmra.mxu0 %vm86_vm0, %v1771_v34 }
0x1175   :  { %v1801_v63 = vpop.f32.mrf.mxu0 }
0x1176   :  { %v2756_v36 = vadd.f32 %v2030_v1, %v1801_v63 }
0x1178   :  { %v1807_v18 = vmul.f32 %v2756_v36, %v2756_v36 }
0x117a   :  { %v1809_v40 = vrot.slane %v1807_v18, 4 }
0x117c   :  { %v1810_v44 = vadd.f32 %v1809_v40, %v1807_v18 }
0x117d   :  { %v1804_v45 = vpop.f32.mrf.mxu0 }
0x117e   :  { %v1811_v0 = vrot.slane %v1810_v44, 2  ;;  %v2760_v30 = vadd.f32 %v2030_v1, %v1804_v45 }
0x1180   :  { %v1812_v48 = vadd.f32 %v1811_v0, %v1810_v44  ;;  %v1808_v39 = vmul.f32 %v2760_v30, %v2760_v30 }
0x1182   :  { %v1813_v19 = vrot.slane %v1812_v48, 1  ;;  %v1815_v51 = vrot.slane %v1808_v39, 4 }
0x1184   :  { %v1814_v26 = vadd.f32 %v1813_v19, %v1812_v48  ;;  %v1816_v61 = vadd.f32 %v1815_v51, %v1808_v39 }
0x1186   :  { %2135 = vrsqrt.f32 %v1814_v26  ;;  %v1817_v53 = vrot.slane %v1816_v61, 2  ;;  %vm1828_vm0 = vcmp.eq.f32.partialorder %v1814_v26, inf  ;;  %v1831_v58 = vand.u32 2147483648, %v1814_v26 }
0x1187   :  { %vm1830_vm11 = vcmp.eq.f32.partialorder %v1814_v26, 0.0 }
0x1188   :  { %v1818_v62 = vadd.f32 %v1817_v53, %v1816_v61 }
0x118a   :  { %v1819_v4 = vrot.slane %v1818_v62, 1 }
0x118c   :  { %v2136_v42 = vpop.eup %2135  ;;  %v1820_v3 = vadd.f32 %v1819_v4, %v1818_v62 }
0x118d   :  { %v1822_v7 = vmul.f32 %v2136_v42, %v1814_v26 }
0x118e   :  { %2137 = vrsqrt.f32 %v1820_v3  ;;  %vm1840_vm12 = vcmp.eq.f32.partialorder %v1820_v3, inf  ;;  %v1843_v24 = vand.u32 2147483648, %v1820_v3  ;;  %vm1842_vm14 = vcmp.eq.f32.partialorder %v1820_v3, 0.0 }
0x118f   :  { %v1823_v32 = vmul.f32 %v2136_v42, %v1822_v7 }
0x1191   :  { %v1824_v52 = vmul.f32 0.5, %v1823_v32 }
0x1193   :  { %v1825_v54 = vsub.f32 1.5, %v1824_v52 }
0x1194   :  { %v2138_v12 = vpop.eup %2137 }
0x1195   :  { %v1826_v55 = vmul.f32 %v2136_v42, %v1825_v54  ;;  %v1834_v2 = vmul.f32 %v2138_v12, %v1820_v3 }
0x1197   :  { %v1827_v57 = vmul.f32 %v1826_v55, %v1814_v26  ;;  %v1835_v60 = vmul.f32 %v2138_v12, %v1834_v2 }
0x1199   :  { %v1829_v20 = vsel %vm1828_vm0, %v1814_v26, %v1827_v57  ;;  %v1836_v47 = vmul.f32 0.5, %v1835_v60 }
0x119a   :  { %v1832_v46 = vsel %vm1830_vm11, %v1831_v58, %v1829_v20 }
0x119b   :  { %v1845_v5 = vmax.f32 %v1832_v46, 1e-12  ;;  %v1837_v41 = vsub.f32 1.5, %v1836_v47 }
0x119d   :  { %2139 = vrcp.f32 %v1845_v5  ;;  %v1838_v16 = vmul.f32 %v2138_v12, %v1837_v41  ;;  %v1858_v25 = vand.u32 2147483648, %v1845_v5  ;;  %v1856_v9 = vand.u32 2147483647, %v1845_v5 }
0x119e   :  { %vm1852_vm1 = vweird.f32 %v1845_v5 }
0x119f   :  { %v1839_v21 = vmul.f32 %v1838_v16, %v1820_v3  ;;  %v1859_v10 = vor.u32 1.1754944e-38, %v1858_v25  ;;  %vm1857_vm13 = vcmp.eq.f32.partialorder %v1856_v9, 8.507059e+37 }
0x11a1   :  { %v1841_v38 = vsel %vm1840_vm12, %v1820_v3, %v1839_v21 }
0x11a2   :  { %v1844_v50 = vsel %vm1842_vm14, %v1843_v24, %v1841_v38 }
0x11a3   :  { %v2140_v56 = vpop.eup %2139  ;;  %v1846_v8 = vmax.f32 %v1844_v50, 1e-12 }
0x11a4   :  { %v1848_v37 = vmul.f32 %v2140_v56, %v1845_v5  ;;  %vm1853_vm15 = vweird.f32 %v2140_v56 }
0x11a5   :  { %2141 = vrcp.f32 %v1846_v8  ;;  %vm1854_vm2 = vmor %vm1852_vm1, %vm1853_vm15  ;;  %v1872_v43 = vand.u32 2147483648, %v1846_v8  ;;  %v1870_v28 = vand.u32 2147483647, %v1846_v8  ;;  %vm1866_vm4 = vweird.f32 %v1846_v8 }
0x11a6   :  { %v1849_v49 = vsub.f32 1.0, %v1848_v37 }
0x11a7   :  { %v1873_v27 = vor.u32 1.1754944e-38, %v1872_v43  ;;  %vm1871_vm6 = vcmp.eq.f32.partialorder %v1870_v28, 8.507059e+37 }
0x11a8   :  { %v1850_v11 = vmul.f32 %v2140_v56, %v1849_v49 }
0x11aa   :  { %v1851_v31 = vadd.f32 %v2140_v56, %v1850_v11 }
0x11ab   :  { %v2142_v13 = vpop.eup %2141 }
0x11ac   :  { %v1855_v14 = vsel %vm1854_vm2, %v2140_v56, %v1851_v31  ;;  %v1862_v17 = vmul.f32 %v2142_v13, %v1846_v8  ;;  %vm1867_vm3 = vweird.f32 %v2142_v13 }
0x11ad   :  { %v1860_v22 = vsel %vm1857_vm13, %v1859_v10, %v1855_v14  ;;  %vm1868_vm5 = vmor %vm1866_vm4, %vm1867_vm3 }
0x11ae   :  { %v1875_v6 = vmul.f32 %v1860_v22, %v2756_v36  ;;  %v1863_v15 = vsub.f32 1.0, %v1862_v17 }
0x11b0   :  { %1877 = vst [vmem:[#allocation7] sm:$0xff] %v1875_v6  ;;  %v1864_v23 = vmul.f32 %v2142_v13, %v1863_v15 }
0x11b2   :  { %v1865_v29 = vadd.f32 %v2142_v13, %v1864_v23 }
0x11b4   :  { %v1869_v59 = vsel %vm1868_vm5, %v2142_v13, %v1865_v29 }
0x11b5   :  { %v1874_v33 = vsel %vm1871_vm6, %v1873_v27, %v1869_v59 }
0x11b6   :  { %v1876_v35 = vmul.f32 %v1874_v33, %v2760_v30 }
0x11b8   :  { %1878 = vst [vmem:[#allocation7 + $0x8] sm:$0xff] %v1876_v35 }
0x11b9   :  { %1891 = dma.vmem_to_hbm [thread:$0]  %s1884_s22, 256, %s1886_s25, [#allocation4], %s2224_s17, %s2224_s17, %s2225_s18  }
0x11ba   :  { %2221 = dma.done.wait [#allocation4], 256  }
0x11bb   :  { %2222 = vsyncadd [#allocation4], 4294967040 }
0x11bc   :  { %1896 = vsyncpa [#allocation3], 1 }
0x11bd   :  { %1897 = vsyncpa [#allocation6], 1 }
0x11be   :  { %1898 = vsyncpa [#allocation4], 1 }

</bundles_post_ra>
